<compile_context>
chip_gen: v7x
topology: tpu7x:2x2x1
jax: 0.10.0
libtpu: 0.0.40
codegen_flags: <defaults>
</compile_context>

<pallas_src>
import functools

import jax
import jax.numpy as jnp
import numpy as np
from jax.experimental import pallas as pl
from jax.experimental.pallas import tpu as pltpu


# ----------------------------- Pallas kernel --------------------------------
def _model_kernel(xidx_ref,      # (B, T)   int32 token indices (SMEM)
                  embp_ref,      # (V, 4H)  pre-projected embedding table (gate-scaled, +b0)
                  wbig_ref,      # (2H, 8H) fused recurrent weights  [[whh0, wih1],[0, whh1]]
                  b1_ref,        # (1, 4H)  layer-1 combined bias (gate-scaled)
                  fcw_ref,       # (H, V)   final Linear weight (pre-transposed)
                  fcb_ref,       # (1, V)   final Linear bias
                  out_ref,       # (B, T, V)  output logits
                  hn_ref,        # (2, B, H)  final hidden state per layer
                  cn_ref,        # (2, B, H)  final cell state per layer
                  xp0_ref,       # scratch (T, B, 4H)  gathered layer-0 input projections
                  hseq_ref):     # scratch (T, B, H)   layer-1 hidden sequence
    T, B, fourH = xp0_ref.shape
    H = fourH // 4

    # ---- prologue: gather pre-projected embeddings for every token (off the
    #      serial path; per-step loop then only does one contiguous load) ------
    for t in range(T):
        for b in range(B):
            tok = xidx_ref[b, t]
            xp0_ref[t, b:b + 1, :] = embp_ref[pl.ds(tok, 1), :]

    # ---- load weights once; hoist bias broadcast out of the time loop --------
    wbig = wbig_ref[...]                                    # (2H, 8H)
    b1 = jnp.broadcast_to(b1_ref[...], (B, fourH))          # (B, 4H)

    def half_cell(gates_scaled, c):
        # Gates arrive with the g-gate columns pre-scaled by 2, so ONE
        # full-width sigmoid covers i, f, o and (via tanh(x)=2*sigmoid(2x)-1) g.
        sg = jax.nn.sigmoid(gates_scaled)                   # (B, 4H) single EUP pass
        i = sg[:, 0 * H:1 * H]
        f = sg[:, 1 * H:2 * H]
        g = 2.0 * sg[:, 2 * H:3 * H] - 1.0                  # tanh(g_pre)
        o = sg[:, 3 * H:4 * H]
        c_new = f * c + i * g
        h_new = o * jnp.tanh(c_new)
        return h_new, c_new

    zeros_bh = jnp.zeros((B, H), jnp.float32)

    # ---- wavefront step s = 0: layer 0 at t=0 only (h0[-1]=0 => no matmul) ----
    h0, c0 = half_cell(xp0_ref[0], zeros_bh)
    h1, c1 = zeros_bh, zeros_bh

    # ---- main wavefront s = 1 .. T-1:
    #      layer 0 at t=s and layer 1 at t=s-1, fused into ONE MXU matmul -------
    def step(s, carry):
        h0p, c0p, h1p, c1p = carry          # h0p = h0[s-1], h1p = h1[s-2]
        zin = jnp.concatenate([h0p, h1p], axis=-1)                       # (B, 2H)
        gall = jnp.dot(zin, wbig, preferred_element_type=jnp.float32)    # (B, 8H)
        g0 = gall[:, :fourH] + xp0_ref[s]          # layer 0 gates at t = s
        g1 = gall[:, fourH:] + b1                  # layer 1 gates at t = s-1
        h0n, c0n = half_cell(g0, c0p)
        h1n, c1n = half_cell(g1, c1p)
        hseq_ref[s - 1] = h1n
        return (h0n, c0n, h1n, c1n)

    h0, c0, h1, c1 = jax.lax.fori_loop(1, T, step, (h0, c0, h1, c1), unroll=True)

    # ---- epilogue s = T: layer 1 at t = T-1 -----------------------------------
    zin = jnp.concatenate([h0, h1], axis=-1)
    gall = jnp.dot(zin, wbig, preferred_element_type=jnp.float32)
    h1, c1 = half_cell(gall[:, fourH:] + b1, c1)
    hseq_ref[T - 1] = h1

    # ---- final states written exactly once -----------------------------------
    hn_ref[0] = h0
    hn_ref[1] = h1
    cn_ref[0] = c0
    cn_ref[1] = c1

    # ---- final Linear fused in-kernel (off the serial path): one matmul per
    #      batch row, written directly in (B, T, V) order -----------------------
    fcw = fcw_ref[...]                                      # (H, V)
    fcb = fcb_ref[...]                                      # (1, V)
    for b in range(B):
        hb = jnp.concatenate([hseq_ref[t, b:b + 1, :] for t in range(T)], axis=0)  # (T, H)
        out_ref[b] = jnp.dot(hb, fcw, preferred_element_type=jnp.float32) + fcb


# ------------------------------ wrapper --------------------------------------
def pack_params(params):
    """One-time parameter packing (kept out of the per-call path)."""
    H = params["whh0"].shape[1]
    fourH = 4 * H
    # Scale the g-gate (3rd quarter) columns by 2 so tanh(x) = 2*sigmoid(2x)-1
    # can be folded into a single full-vreg sigmoid inside the kernel.
    gscale = jnp.concatenate([jnp.ones((2 * H,), jnp.float32),
                              2.0 * jnp.ones((H,), jnp.float32),
                              jnp.ones((H,), jnp.float32)])

    # Fuse the embedding lookup with the layer-0 input projection + bias:
    #   (emb @ W_ih0.T + b0)[token]  ==  W_ih0 @ emb[token] + b0
    emb_proj = (params["emb"] @ params["wih0"].T
                + params["bih0"] + params["bhh0"]) * gscale          # (V, 4H)

    whh0_s = params["whh0"].T * gscale                               # (H, 4H)
    wih1_s = params["wih1"].T * gscale                               # (H, 4H)
    whh1_s = params["whh1"].T * gscale                               # (H, 4H)
    w_big = jnp.concatenate(
        [jnp.concatenate([whh0_s, wih1_s], axis=1),
         jnp.concatenate([jnp.zeros((H, fourH), jnp.float32), whh1_s], axis=1)],
        axis=0)                                                      # (2H, 8H)

    b1 = ((params["bih1"] + params["bhh1"]) * gscale)[None, :]       # (1, 4H)
    fcw_t = params["fcw"].T                                          # (H, V)
    fcb = params["fcb"][None, :]                                     # (1, V)
    return {"emb_proj": emb_proj, "w_big": w_big, "b1": b1,
            "fcw_t": fcw_t, "fcb": fcb, "H": H}


@functools.partial(jax.jit, static_argnames=())
def model_forward(x_idx, packed):
    """x_idx: (B, T) int32.  Returns (logits (B,T,V), (h_n, c_n)) like PyTorch."""
    B, T = x_idx.shape
    V, fourH = packed["emb_proj"].shape
    H = fourH // 4

    vmem = pl.BlockSpec(memory_space=pltpu.MemorySpace.VMEM)
    smem = pl.BlockSpec(memory_space=pltpu.MemorySpace.SMEM)

    out, h_n, c_n = pl.pallas_call(
        _model_kernel,
        out_shape=(
            jax.ShapeDtypeStruct((B, T, V), jnp.float32),
            jax.ShapeDtypeStruct((2, B, H), jnp.float32),
            jax.ShapeDtypeStruct((2, B, H), jnp.float32),
        ),
        in_specs=[smem, vmem, vmem, vmem, vmem, vmem],
        out_specs=(vmem, vmem, vmem),
        scratch_shapes=[
            pltpu.VMEM((T, B, fourH), jnp.float32),   # gathered layer-0 input projections
            pltpu.VMEM((T, B, H), jnp.float32),       # layer-1 hidden sequence
        ],
    )(x_idx, packed["emb_proj"], packed["w_big"], packed["b1"],
      packed["fcw_t"], packed["fcb"])
    return out, (h_n, c_n)


# --------------------------- pure-JAX reference -------------------------------
def reference_forward(x_idx, params):
    emb = params["emb"]
    x = jnp.take(emb, x_idx, axis=0)          # (B, T, E)
    B, T, E = x.shape
    H = params["whh0"].shape[1]

    def cell(x, h, c, wih, whh, bih, bhh):
        g = x @ wih.T + bih + h @ whh.T + bhh
        i, f, gg, o = jnp.split(g, 4, axis=-1)
        i, f, o = jax.nn.sigmoid(i), jax.nn.sigmoid(f), jax.nn.sigmoid(o)
        gg = jnp.tanh(gg)
        c_new = f * c + i * gg
        return o * jnp.tanh(c_new), c_new

    def step(carry, xt):
        h0, c0, h1, c1 = carry
        h0, c0 = cell(xt, h0, c0, params["wih0"], params["whh0"], params["bih0"], params["bhh0"])
        h1, c1 = cell(h0, h1, c1, params["wih1"], params["whh1"], params["bih1"], params["bhh1"])
        return (h0, c0, h1, c1), h1

    z = jnp.zeros((B, H), jnp.float32)
    (h0, c0, h1, c1), ys = jax.lax.scan(step, (z, z, z, z), jnp.transpose(x, (1, 0, 2)))
    out = jnp.transpose(ys, (1, 0, 2)) @ params["fcw"].T + params["fcb"]
    h_n = jnp.stack([h0, h1])
    c_n = jnp.stack([c0, c1])
    return out, (h_n, c_n)


# ------------------------------ main ------------------------------------------
if __name__ == "__main__":
    # Small shapes consistent with the module:
    #   input_size (embedding dim) E = 16, hidden_size H = 32,
    #   output_size (vocab) V = 28, batch B = 2, sequence T = 8.
    B, T, E, H, V = 2, 8, 16, 32, 28

    key = jax.random.PRNGKey(0)
    ks = jax.random.split(key, 12)
    s = 1.0 / np.sqrt(H)
    uni = lambda k, shape: jax.random.uniform(k, shape, jnp.float32, -s, s)

    params = {
        "emb":  jax.random.normal(ks[0], (V, E), jnp.float32),
        "wih0": uni(ks[1], (4 * H, E)),
        "whh0": uni(ks[2], (4 * H, H)),
        "bih0": uni(ks[3], (4 * H,)),
        "bhh0": uni(ks[4], (4 * H,)),
        "wih1": uni(ks[5], (4 * H, H)),
        "whh1": uni(ks[6], (4 * H, H)),
        "bih1": uni(ks[7], (4 * H,)),
        "bhh1": uni(ks[8], (4 * H,)),
        "fcw":  uni(ks[9], (V, H)),
        "fcb":  uni(ks[10], (V,)),
    }

    x_idx = jax.random.randint(ks[11], (B, T), 0, V, dtype=jnp.int32)

    packed = pack_params(params)
    out, (h_n, c_n) = model_forward(x_idx, packed)
    jax.block_until_ready((out, h_n, c_n))

    ref_out, (ref_h, ref_c) = reference_forward(x_idx, params)
    assert out.shape == (B, T, V) and h_n.shape == (2, B, H) and c_n.shape == (2, B, H)
    np.testing.assert_allclose(np.asarray(out), np.asarray(ref_out), atol=1e-4, rtol=1e-4)
    np.testing.assert_allclose(np.asarray(h_n), np.asarray(ref_h), atol=1e-4, rtol=1e-4)
    np.testing.assert_allclose(np.asarray(c_n), np.asarray(ref_c), atol=1e-4, rtol=1e-4)

    print("KERNEL_OK")
</pallas_src>

<mosaic_0001>
module attributes {stable_mosaic.version = 11 : i64} {
  func.func @_model_kernel(%arg0: memref<2x8xi32, #tpu.memory_space<smem>>, %arg1: memref<28x128xf32, #tpu.memory_space<vmem>>, %arg2: memref<64x256xf32, #tpu.memory_space<vmem>>, %arg3: memref<1x128xf32, #tpu.memory_space<vmem>>, %arg4: memref<32x28xf32, #tpu.memory_space<vmem>>, %arg5: memref<1x28xf32, #tpu.memory_space<vmem>>, %arg6: memref<2x8x28xf32, #tpu.memory_space<vmem>>, %arg7: memref<2x2x32xf32, #tpu.memory_space<vmem>>, %arg8: memref<2x2x32xf32, #tpu.memory_space<vmem>>, %arg9: memref<8x2x128xf32, #tpu.memory_space<vmem>>, %arg10: memref<8x2x32xf32, #tpu.memory_space<vmem>>) attributes {dimension_semantics = [], scalar_prefetch = 0 : i64, scratch_operands = 2 : i64, tpu.core_type = #tpu.core_type<tc>} {
    %c0 = arith.constant 0 : index
    %c0_0 = arith.constant 0 : index
    %0 = memref.load %arg0[%c0, %c0_0] : memref<2x8xi32, #tpu.memory_space<smem>>
    %1 = arith.index_cast %0 : i32 to index
    %c0_1 = arith.constant 0 : index
    %2 = vector.load %arg1[%1, %c0_1] : memref<28x128xf32, #tpu.memory_space<vmem>>, vector<1x128xf32>
    %c0_2 = arith.constant 0 : index
    %c0_3 = arith.constant 0 : index
    %c0_4 = arith.constant 0 : index
    %3 = vector.load %arg9[%c0_2, %c0_3, %c0_4] : memref<8x2x128xf32, #tpu.memory_space<vmem>>, vector<1x1x128xf32>
    %4 = vector.shape_cast %3 : vector<1x1x128xf32> to vector<1x128xf32>
    %5 = vector.shape_cast %2 : vector<1x128xf32> to vector<1x1x128xf32>
    tpu.vector_store %arg9[%c0_2, %c0_3, %c0_4], %5 {strides = array<i32>} : memref<8x2x128xf32, #tpu.memory_space<vmem>>, vector<1x1x128xf32>,
    %c1 = arith.constant 1 : index
    %c0_5 = arith.constant 0 : index
    %6 = memref.load %arg0[%c1, %c0_5] : memref<2x8xi32, #tpu.memory_space<smem>>
    %7 = arith.index_cast %6 : i32 to index
    %c0_6 = arith.constant 0 : index
    %8 = vector.load %arg1[%7, %c0_6] : memref<28x128xf32, #tpu.memory_space<vmem>>, vector<1x128xf32>
    %c0_7 = arith.constant 0 : index
    %c1_8 = arith.constant 1 : index
    %c0_9 = arith.constant 0 : index
    %9 = vector.load %arg9[%c0_7, %c1_8, %c0_9] : memref<8x2x128xf32, #tpu.memory_space<vmem>>, vector<1x1x128xf32>
    %10 = vector.shape_cast %9 : vector<1x1x128xf32> to vector<1x128xf32>
    %11 = vector.shape_cast %8 : vector<1x128xf32> to vector<1x1x128xf32>
    tpu.vector_store %arg9[%c0_7, %c1_8, %c0_9], %11 {strides = array<i32>} : memref<8x2x128xf32, #tpu.memory_space<vmem>>, vector<1x1x128xf32>,
    %c0_10 = arith.constant 0 : index
    %c1_11 = arith.constant 1 : index
    %12 = memref.load %arg0[%c0_10, %c1_11] : memref<2x8xi32, #tpu.memory_space<smem>>
    %13 = arith.index_cast %12 : i32 to index
    %c0_12 = arith.constant 0 : index
    %14 = vector.load %arg1[%13, %c0_12] : memref<28x128xf32, #tpu.memory_space<vmem>>, vector<1x128xf32>
    %c1_13 = arith.constant 1 : index
    %c0_14 = arith.constant 0 : index
    %c0_15 = arith.constant 0 : index
    %15 = vector.load %arg9[%c1_13, %c0_14, %c0_15] : memref<8x2x128xf32, #tpu.memory_space<vmem>>, vector<1x1x128xf32>
    %16 = vector.shape_cast %15 : vector<1x1x128xf32> to vector<1x128xf32>
    %17 = vector.shape_cast %14 : vector<1x128xf32> to vector<1x1x128xf32>
    tpu.vector_store %arg9[%c1_13, %c0_14, %c0_15], %17 {strides = array<i32>} : memref<8x2x128xf32, #tpu.memory_space<vmem>>, vector<1x1x128xf32>,
    %c1_16 = arith.constant 1 : index
    %c1_17 = arith.constant 1 : index
    %18 = memref.load %arg0[%c1_16, %c1_17] : memref<2x8xi32, #tpu.memory_space<smem>>
    %19 = arith.index_cast %18 : i32 to index
    %c0_18 = arith.constant 0 : index
    %20 = vector.load %arg1[%19, %c0_18] : memref<28x128xf32, #tpu.memory_space<vmem>>, vector<1x128xf32>
    %c1_19 = arith.constant 1 : index
    %c1_20 = arith.constant 1 : index
    %c0_21 = arith.constant 0 : index
    %21 = vector.load %arg9[%c1_19, %c1_20, %c0_21] : memref<8x2x128xf32, #tpu.memory_space<vmem>>, vector<1x1x128xf32>
    %22 = vector.shape_cast %21 : vector<1x1x128xf32> to vector<1x128xf32>
    %23 = vector.shape_cast %20 : vector<1x128xf32> to vector<1x1x128xf32>
    tpu.vector_store %arg9[%c1_19, %c1_20, %c0_21], %23 {strides = array<i32>} : memref<8x2x128xf32, #tpu.memory_space<vmem>>, vector<1x1x128xf32>,
    %c0_22 = arith.constant 0 : index
    %c2 = arith.constant 2 : index
    %24 = memref.load %arg0[%c0_22, %c2] : memref<2x8xi32, #tpu.memory_space<smem>>
    %25 = arith.index_cast %24 : i32 to index
    %c0_23 = arith.constant 0 : index
    %26 = vector.load %arg1[%25, %c0_23] : memref<28x128xf32, #tpu.memory_space<vmem>>, vector<1x128xf32>
    %c2_24 = arith.constant 2 : index
    %c0_25 = arith.constant 0 : index
    %c0_26 = arith.constant 0 : index
    %27 = vector.load %arg9[%c2_24, %c0_25, %c0_26] : memref<8x2x128xf32, #tpu.memory_space<vmem>>, vector<1x1x128xf32>
    %28 = vector.shape_cast %27 : vector<1x1x128xf32> to vector<1x128xf32>
    %29 = vector.shape_cast %26 : vector<1x128xf32> to vector<1x1x128xf32>
    tpu.vector_store %arg9[%c2_24, %c0_25, %c0_26], %29 {strides = array<i32>} : memref<8x2x128xf32, #tpu.memory_space<vmem>>, vector<1x1x128xf32>,
    %c1_27 = arith.constant 1 : index
    %c2_28 = arith.constant 2 : index
    %30 = memref.load %arg0[%c1_27, %c2_28] : memref<2x8xi32, #tpu.memory_space<smem>>
    %31 = arith.index_cast %30 : i32 to index
    %c0_29 = arith.constant 0 : index
    %32 = vector.load %arg1[%31, %c0_29] : memref<28x128xf32, #tpu.memory_space<vmem>>, vector<1x128xf32>
    %c2_30 = arith.constant 2 : index
    %c1_31 = arith.constant 1 : index
    %c0_32 = arith.constant 0 : index
    %33 = vector.load %arg9[%c2_30, %c1_31, %c0_32] : memref<8x2x128xf32, #tpu.memory_space<vmem>>, vector<1x1x128xf32>
    %34 = vector.shape_cast %33 : vector<1x1x128xf32> to vector<1x128xf32>
    %35 = vector.shape_cast %32 : vector<1x128xf32> to vector<1x1x128xf32>
    tpu.vector_store %arg9[%c2_30, %c1_31, %c0_32], %35 {strides = array<i32>} : memref<8x2x128xf32, #tpu.memory_space<vmem>>, vector<1x1x128xf32>,
    %c0_33 = arith.constant 0 : index
    %c3 = arith.constant 3 : index
    %36 = memref.load %arg0[%c0_33, %c3] : memref<2x8xi32, #tpu.memory_space<smem>>
    %37 = arith.index_cast %36 : i32 to index
    %c0_34 = arith.constant 0 : index
    %38 = vector.load %arg1[%37, %c0_34] : memref<28x128xf32, #tpu.memory_space<vmem>>, vector<1x128xf32>
    %c3_35 = arith.constant 3 : index
    %c0_36 = arith.constant 0 : index
    %c0_37 = arith.constant 0 : index
    %39 = vector.load %arg9[%c3_35, %c0_36, %c0_37] : memref<8x2x128xf32, #tpu.memory_space<vmem>>, vector<1x1x128xf32>
    %40 = vector.shape_cast %39 : vector<1x1x128xf32> to vector<1x128xf32>
    %41 = vector.shape_cast %38 : vector<1x128xf32> to vector<1x1x128xf32>
    tpu.vector_store %arg9[%c3_35, %c0_36, %c0_37], %41 {strides = array<i32>} : memref<8x2x128xf32, #tpu.memory_space<vmem>>, vector<1x1x128xf32>,
    %c1_38 = arith.constant 1 : index
    %c3_39 = arith.constant 3 : index
    %42 = memref.load %arg0[%c1_38, %c3_39] : memref<2x8xi32, #tpu.memory_space<smem>>
    %43 = arith.index_cast %42 : i32 to index
    %c0_40 = arith.constant 0 : index
    %44 = vector.load %arg1[%43, %c0_40] : memref<28x128xf32, #tpu.memory_space<vmem>>, vector<1x128xf32>
    %c3_41 = arith.constant 3 : index
    %c1_42 = arith.constant 1 : index
    %c0_43 = arith.constant 0 : index
    %45 = vector.load %arg9[%c3_41, %c1_42, %c0_43] : memref<8x2x128xf32, #tpu.memory_space<vmem>>, vector<1x1x128xf32>
    %46 = vector.shape_cast %45 : vector<1x1x128xf32> to vector<1x128xf32>
    %47 = vector.shape_cast %44 : vector<1x128xf32> to vector<1x1x128xf32>
    tpu.vector_store %arg9[%c3_41, %c1_42, %c0_43], %47 {strides = array<i32>} : memref<8x2x128xf32, #tpu.memory_space<vmem>>, vector<1x1x128xf32>,
    %c0_44 = arith.constant 0 : index
    %c4 = arith.constant 4 : index
    %48 = memref.load %arg0[%c0_44, %c4] : memref<2x8xi32, #tpu.memory_space<smem>>
    %49 = arith.index_cast %48 : i32 to index
    %c0_45 = arith.constant 0 : index
    %50 = vector.load %arg1[%49, %c0_45] : memref<28x128xf32, #tpu.memory_space<vmem>>, vector<1x128xf32>
    %c4_46 = arith.constant 4 : index
    %c0_47 = arith.constant 0 : index
    %c0_48 = arith.constant 0 : index
    %51 = vector.load %arg9[%c4_46, %c0_47, %c0_48] : memref<8x2x128xf32, #tpu.memory_space<vmem>>, vector<1x1x128xf32>
    %52 = vector.shape_cast %51 : vector<1x1x128xf32> to vector<1x128xf32>
    %53 = vector.shape_cast %50 : vector<1x128xf32> to vector<1x1x128xf32>
    tpu.vector_store %arg9[%c4_46, %c0_47, %c0_48], %53 {strides = array<i32>} : memref<8x2x128xf32, #tpu.memory_space<vmem>>, vector<1x1x128xf32>,
    %c1_49 = arith.constant 1 : index
    %c4_50 = arith.constant 4 : index
    %54 = memref.load %arg0[%c1_49, %c4_50] : memref<2x8xi32, #tpu.memory_space<smem>>
    %55 = arith.index_cast %54 : i32 to index
    %c0_51 = arith.constant 0 : index
    %56 = vector.load %arg1[%55, %c0_51] : memref<28x128xf32, #tpu.memory_space<vmem>>, vector<1x128xf32>
    %c4_52 = arith.constant 4 : index
    %c1_53 = arith.constant 1 : index
    %c0_54 = arith.constant 0 : index
    %57 = vector.load %arg9[%c4_52, %c1_53, %c0_54] : memref<8x2x128xf32, #tpu.memory_space<vmem>>, vector<1x1x128xf32>
    %58 = vector.shape_cast %57 : vector<1x1x128xf32> to vector<1x128xf32>
    %59 = vector.shape_cast %56 : vector<1x128xf32> to vector<1x1x128xf32>
    tpu.vector_store %arg9[%c4_52, %c1_53, %c0_54], %59 {strides = array<i32>} : memref<8x2x128xf32, #tpu.memory_space<vmem>>, vector<1x1x128xf32>,
    %c0_55 = arith.constant 0 : index
    %c5 = arith.constant 5 : index
    %60 = memref.load %arg0[%c0_55, %c5] : memref<2x8xi32, #tpu.memory_space<smem>>
    %61 = arith.index_cast %60 : i32 to index
    %c0_56 = arith.constant 0 : index
    %62 = vector.load %arg1[%61, %c0_56] : memref<28x128xf32, #tpu.memory_space<vmem>>, vector<1x128xf32>
    %c5_57 = arith.constant 5 : index
    %c0_58 = arith.constant 0 : index
    %c0_59 = arith.constant 0 : index
    %63 = vector.load %arg9[%c5_57, %c0_58, %c0_59] : memref<8x2x128xf32, #tpu.memory_space<vmem>>, vector<1x1x128xf32>
    %64 = vector.shape_cast %63 : vector<1x1x128xf32> to vector<1x128xf32>
    %65 = vector.shape_cast %62 : vector<1x128xf32> to vector<1x1x128xf32>
    tpu.vector_store %arg9[%c5_57, %c0_58, %c0_59], %65 {strides = array<i32>} : memref<8x2x128xf32, #tpu.memory_space<vmem>>, vector<1x1x128xf32>,
    %c1_60 = arith.constant 1 : index
    %c5_61 = arith.constant 5 : index
    %66 = memref.load %arg0[%c1_60, %c5_61] : memref<2x8xi32, #tpu.memory_space<smem>>
    %67 = arith.index_cast %66 : i32 to index
    %c0_62 = arith.constant 0 : index
    %68 = vector.load %arg1[%67, %c0_62] : memref<28x128xf32, #tpu.memory_space<vmem>>, vector<1x128xf32>
    %c5_63 = arith.constant 5 : index
    %c1_64 = arith.constant 1 : index
    %c0_65 = arith.constant 0 : index
    %69 = vector.load %arg9[%c5_63, %c1_64, %c0_65] : memref<8x2x128xf32, #tpu.memory_space<vmem>>, vector<1x1x128xf32>
    %70 = vector.shape_cast %69 : vector<1x1x128xf32> to vector<1x128xf32>
    %71 = vector.shape_cast %68 : vector<1x128xf32> to vector<1x1x128xf32>
    tpu.vector_store %arg9[%c5_63, %c1_64, %c0_65], %71 {strides = array<i32>} : memref<8x2x128xf32, #tpu.memory_space<vmem>>, vector<1x1x128xf32>,
    %c0_66 = arith.constant 0 : index
    %c6 = arith.constant 6 : index
    %72 = memref.load %arg0[%c0_66, %c6] : memref<2x8xi32, #tpu.memory_space<smem>>
    %73 = arith.index_cast %72 : i32 to index
    %c0_67 = arith.constant 0 : index
    %74 = vector.load %arg1[%73, %c0_67] : memref<28x128xf32, #tpu.memory_space<vmem>>, vector<1x128xf32>
    %c6_68 = arith.constant 6 : index
    %c0_69 = arith.constant 0 : index
    %c0_70 = arith.constant 0 : index
    %75 = vector.load %arg9[%c6_68, %c0_69, %c0_70] : memref<8x2x128xf32, #tpu.memory_space<vmem>>, vector<1x1x128xf32>
    %76 = vector.shape_cast %75 : vector<1x1x128xf32> to vector<1x128xf32>
    %77 = vector.shape_cast %74 : vector<1x128xf32> to vector<1x1x128xf32>
    tpu.vector_store %arg9[%c6_68, %c0_69, %c0_70], %77 {strides = array<i32>} : memref<8x2x128xf32, #tpu.memory_space<vmem>>, vector<1x1x128xf32>,
    %c1_71 = arith.constant 1 : index
    %c6_72 = arith.constant 6 : index
    %78 = memref.load %arg0[%c1_71, %c6_72] : memref<2x8xi32, #tpu.memory_space<smem>>
    %79 = arith.index_cast %78 : i32 to index
    %c0_73 = arith.constant 0 : index
    %80 = vector.load %arg1[%79, %c0_73] : memref<28x128xf32, #tpu.memory_space<vmem>>, vector<1x128xf32>
    %c6_74 = arith.constant 6 : index
    %c1_75 = arith.constant 1 : index
    %c0_76 = arith.constant 0 : index
    %81 = vector.load %arg9[%c6_74, %c1_75, %c0_76] : memref<8x2x128xf32, #tpu.memory_space<vmem>>, vector<1x1x128xf32>
    %82 = vector.shape_cast %81 : vector<1x1x128xf32> to vector<1x128xf32>
    %83 = vector.shape_cast %80 : vector<1x128xf32> to vector<1x1x128xf32>
    tpu.vector_store %arg9[%c6_74, %c1_75, %c0_76], %83 {strides = array<i32>} : memref<8x2x128xf32, #tpu.memory_space<vmem>>, vector<1x1x128xf32>,
    %c0_77 = arith.constant 0 : index
    %c7 = arith.constant 7 : index
    %84 = memref.load %arg0[%c0_77, %c7] : memref<2x8xi32, #tpu.memory_space<smem>>
    %85 = arith.index_cast %84 : i32 to index
    %c0_78 = arith.constant 0 : index
    %86 = vector.load %arg1[%85, %c0_78] : memref<28x128xf32, #tpu.memory_space<vmem>>, vector<1x128xf32>
    %c7_79 = arith.constant 7 : index
    %c0_80 = arith.constant 0 : index
    %c0_81 = arith.constant 0 : index
    %87 = vector.load %arg9[%c7_79, %c0_80, %c0_81] : memref<8x2x128xf32, #tpu.memory_space<vmem>>, vector<1x1x128xf32>
    %88 = vector.shape_cast %87 : vector<1x1x128xf32> to vector<1x128xf32>
    %89 = vector.shape_cast %86 : vector<1x128xf32> to vector<1x1x128xf32>
    tpu.vector_store %arg9[%c7_79, %c0_80, %c0_81], %89 {strides = array<i32>} : memref<8x2x128xf32, #tpu.memory_space<vmem>>, vector<1x1x128xf32>,
    %c1_82 = arith.constant 1 : index
    %c7_83 = arith.constant 7 : index
    %90 = memref.load %arg0[%c1_82, %c7_83] : memref<2x8xi32, #tpu.memory_space<smem>>
    %91 = arith.index_cast %90 : i32 to index
    %c0_84 = arith.constant 0 : index
    %92 = vector.load %arg1[%91, %c0_84] : memref<28x128xf32, #tpu.memory_space<vmem>>, vector<1x128xf32>
    %c7_85 = arith.constant 7 : index
    %c1_86 = arith.constant 1 : index
    %c0_87 = arith.constant 0 : index
    %93 = vector.load %arg9[%c7_85, %c1_86, %c0_87] : memref<8x2x128xf32, #tpu.memory_space<vmem>>, vector<1x1x128xf32>
    %94 = vector.shape_cast %93 : vector<1x1x128xf32> to vector<1x128xf32>
    %95 = vector.shape_cast %92 : vector<1x128xf32> to vector<1x1x128xf32>
    tpu.vector_store %arg9[%c7_85, %c1_86, %c0_87], %95 {strides = array<i32>} : memref<8x2x128xf32, #tpu.memory_space<vmem>>, vector<1x1x128xf32>,
    %c0_88 = arith.constant 0 : index
    %c0_89 = arith.constant 0 : index
    %96 = vector.load %arg2[%c0_88, %c0_89] : memref<64x256xf32, #tpu.memory_space<vmem>>, vector<64x256xf32>
    %c0_90 = arith.constant 0 : index
    %c0_91 = arith.constant 0 : index
    %97 = vector.load %arg3[%c0_90, %c0_91] : memref<1x128xf32, #tpu.memory_space<vmem>>, vector<1x128xf32>
    %98 = vector.shape_cast %97 : vector<1x128xf32> to vector<1x128xf32>
    %99 = vector.broadcast %98 : vector<1x128xf32> to vector<2x128xf32>
    %cst = arith.constant 0.000000e+00 : f32
    %100 = vector.broadcast %cst : f32 to vector<2x32xf32>
    %c0_92 = arith.constant 0 : index
    %c0_93 = arith.constant 0 : index
    %c0_94 = arith.constant 0 : index
    %101 = vector.load %arg9[%c0_92, %c0_93, %c0_94] : memref<8x2x128xf32, #tpu.memory_space<vmem>>, vector<1x2x128xf32>
    %102 = vector.shape_cast %101 : vector<1x2x128xf32> to vector<2x128xf32>
    %103 = arith.negf %102 : vector<2x128xf32>
    %104 = math.exp %103 : vector<2x128xf32>
    %cst_95 = arith.constant 1.000000e+00 : f32
    %105 = vector.broadcast %cst_95 : f32 to vector<2x128xf32>
    %106 = arith.addf %105, %104 : vector<2x128xf32>
    %107 = arith.divf %105, %106 : vector<2x128xf32>
    %108 = vector.extract_strided_slice %107 {offsets = [0, 0], sizes = [2, 32], strides = [1, 1]} : vector<2x128xf32> to vector<2x32xf32>
    %109 = vector.extract_strided_slice %107 {offsets = [0, 32], sizes = [2, 32], strides = [1, 1]} : vector<2x128xf32> to vector<2x32xf32>
    %110 = vector.extract_strided_slice %107 {offsets = [0, 64], sizes = [2, 32], strides = [1, 1]} : vector<2x128xf32> to vector<2x32xf32>
    %cst_96 = arith.constant 2.000000e+00 : f32
    %111 = vector.broadcast %cst_96 : f32 to vector<2x32xf32>
    %112 = arith.mulf %111, %110 : vector<2x32xf32>
    %cst_97 = arith.constant 1.000000e+00 : f32
    %113 = vector.broadcast %cst_97 : f32 to vector<2x32xf32>
    %114 = arith.subf %112, %113 : vector<2x32xf32>
    %115 = vector.extract_strided_slice %107 {offsets = [0, 96], sizes = [2, 32], strides = [1, 1]} : vector<2x128xf32> to vector<2x32xf32>
    %116 = arith.mulf %109, %100 : vector<2x32xf32>
    %117 = arith.mulf %108, %114 : vector<2x32xf32>
    %118 = arith.addf %116, %117 : vector<2x32xf32>
    %119 = math.tanh %118 : vector<2x32xf32>
    %120 = arith.mulf %115, %119 : vector<2x32xf32>
    %c1_i32 = arith.constant 1 : i32
    %121 = tpu.concatenate %120, %100 in 1 : vector<2x32xf32>, vector<2x32xf32> -> vector<2x64xf32>
    %cst_98 = arith.constant dense<0.000000e+00> : vector<2x256xf32>
    %122 = tpu.matmul %121, %96, %cst_98 {dimension_numbers = #tpu.dot_dimension_numbers<[1], [0], [0], [1], [0, 0, 1, 1], [], []>} : vector<2x64xf32>, vector<64x256xf32>, vector<2x256xf32> -> vector<2x256xf32>
    %123 = vector.extract_strided_slice %122 {offsets = [0, 0], sizes = [2, 128], strides = [1, 1]} : vector<2x256xf32> to vector<2x128xf32>
    %124 = arith.index_cast %c1_i32 : i32 to index
    %c0_99 = arith.constant 0 : index
    %c0_100 = arith.constant 0 : index
    %125 = vector.load %arg9[%124, %c0_99, %c0_100] : memref<8x2x128xf32, #tpu.memory_space<vmem>>, vector<1x2x128xf32>
    %126 = vector.shape_cast %125 : vector<1x2x128xf32> to vector<2x128xf32>
    %127 = arith.addf %123, %126 : vector<2x128xf32>
    %128 = vector.extract_strided_slice %122 {offsets = [0, 128], sizes = [2, 128], strides = [1, 1]} : vector<2x256xf32> to vector<2x128xf32>
    %129 = arith.addf %128, %99 : vector<2x128xf32>
    %130 = arith.negf %127 : vector<2x128xf32>
    %131 = math.exp %130 : vector<2x128xf32>
    %cst_101 = arith.constant 1.000000e+00 : f32
    %132 = vector.broadcast %cst_101 : f32 to vector<2x128xf32>
    %133 = arith.addf %132, %131 : vector<2x128xf32>
    %134 = arith.divf %132, %133 : vector<2x128xf32>
    %135 = vector.extract_strided_slice %134 {offsets = [0, 0], sizes = [2, 32], strides = [1, 1]} : vector<2x128xf32> to vector<2x32xf32>
    %136 = vector.extract_strided_slice %134 {offsets = [0, 32], sizes = [2, 32], strides = [1, 1]} : vector<2x128xf32> to vector<2x32xf32>
    %137 = vector.extract_strided_slice %134 {offsets = [0, 64], sizes = [2, 32], strides = [1, 1]} : vector<2x128xf32> to vector<2x32xf32>
    %cst_102 = arith.constant 2.000000e+00 : f32
    %138 = vector.broadcast %cst_102 : f32 to vector<2x32xf32>
    %139 = arith.mulf %138, %137 : vector<2x32xf32>
    %cst_103 = arith.constant 1.000000e+00 : f32
    %140 = vector.broadcast %cst_103 : f32 to vector<2x32xf32>
    %141 = arith.subf %139, %140 : vector<2x32xf32>
    %142 = vector.extract_strided_slice %134 {offsets = [0, 96], sizes = [2, 32], strides = [1, 1]} : vector<2x128xf32> to vector<2x32xf32>
    %143 = arith.mulf %136, %118 : vector<2x32xf32>
    %144 = arith.mulf %135, %141 : vector<2x32xf32>
    %145 = arith.addf %143, %144 : vector<2x32xf32>
    %146 = math.tanh %145 : vector<2x32xf32>
    %147 = arith.mulf %142, %146 : vector<2x32xf32>
    %148 = arith.negf %129 : vector<2x128xf32>
    %149 = math.exp %148 : vector<2x128xf32>
    %cst_104 = arith.constant 1.000000e+00 : f32
    %150 = vector.broadcast %cst_104 : f32 to vector<2x128xf32>
    %151 = arith.addf %150, %149 : vector<2x128xf32>
    %152 = arith.divf %150, %151 : vector<2x128xf32>
    %153 = vector.extract_strided_slice %152 {offsets = [0, 0], sizes = [2, 32], strides = [1, 1]} : vector<2x128xf32> to vector<2x32xf32>
    %154 = vector.extract_strided_slice %152 {offsets = [0, 32], sizes = [2, 32], strides = [1, 1]} : vector<2x128xf32> to vector<2x32xf32>
    %155 = vector.extract_strided_slice %152 {offsets = [0, 64], sizes = [2, 32], strides = [1, 1]} : vector<2x128xf32> to vector<2x32xf32>
    %cst_105 = arith.constant 2.000000e+00 : f32
    %156 = vector.broadcast %cst_105 : f32 to vector<2x32xf32>
    %157 = arith.mulf %156, %155 : vector<2x32xf32>
    %cst_106 = arith.constant 1.000000e+00 : f32
    %158 = vector.broadcast %cst_106 : f32 to vector<2x32xf32>
    %159 = arith.subf %157, %158 : vector<2x32xf32>
    %160 = vector.extract_strided_slice %152 {offsets = [0, 96], sizes = [2, 32], strides = [1, 1]} : vector<2x128xf32> to vector<2x32xf32>
    %161 = arith.mulf %154, %100 : vector<2x32xf32>
    %162 = arith.mulf %153, %159 : vector<2x32xf32>
    %163 = arith.addf %161, %162 : vector<2x32xf32>
    %164 = math.tanh %163 : vector<2x32xf32>
    %165 = arith.mulf %160, %164 : vector<2x32xf32>
    %c1_i32_107 = arith.constant 1 : i32
    %166 = arith.subi %c1_i32, %c1_i32_107 : i32
    %167 = arith.index_cast %166 : i32 to index
    %c0_108 = arith.constant 0 : index
    %c0_109 = arith.constant 0 : index
    %168 = vector.load %arg10[%167, %c0_108, %c0_109] : memref<8x2x32xf32, #tpu.memory_space<vmem>>, vector<1x2x32xf32>
    %169 = vector.shape_cast %168 : vector<1x2x32xf32> to vector<2x32xf32>
    %170 = vector.shape_cast %165 : vector<2x32xf32> to vector<1x2x32xf32>
    tpu.vector_store %arg10[%167, %c0_108, %c0_109], %170 {strides = array<i32>} : memref<8x2x32xf32, #tpu.memory_space<vmem>>, vector<1x2x32xf32>,
    %c2_i32 = arith.constant 2 : i32
    %171 = tpu.concatenate %147, %165 in 1 : vector<2x32xf32>, vector<2x32xf32> -> vector<2x64xf32>
    %cst_110 = arith.constant dense<0.000000e+00> : vector<2x256xf32>
    %172 = tpu.matmul %171, %96, %cst_110 {dimension_numbers = #tpu.dot_dimension_numbers<[1], [0], [0], [1], [0, 0, 1, 1], [], []>} : vector<2x64xf32>, vector<64x256xf32>, vector<2x256xf32> -> vector<2x256xf32>
    %173 = vector.extract_strided_slice %172 {offsets = [0, 0], sizes = [2, 128], strides = [1, 1]} : vector<2x256xf32> to vector<2x128xf32>
    %174 = arith.index_cast %c2_i32 : i32 to index
    %c0_111 = arith.constant 0 : index
    %c0_112 = arith.constant 0 : index
    %175 = vector.load %arg9[%174, %c0_111, %c0_112] : memref<8x2x128xf32, #tpu.memory_space<vmem>>, vector<1x2x128xf32>
    %176 = vector.shape_cast %175 : vector<1x2x128xf32> to vector<2x128xf32>
    %177 = arith.addf %173, %176 : vector<2x128xf32>
    %178 = vector.extract_strided_slice %172 {offsets = [0, 128], sizes = [2, 128], strides = [1, 1]} : vector<2x256xf32> to vector<2x128xf32>
    %179 = arith.addf %178, %99 : vector<2x128xf32>
    %180 = arith.negf %177 : vector<2x128xf32>
    %181 = math.exp %180 : vector<2x128xf32>
    %cst_113 = arith.constant 1.000000e+00 : f32
    %182 = vector.broadcast %cst_113 : f32 to vector<2x128xf32>
    %183 = arith.addf %182, %181 : vector<2x128xf32>
    %184 = arith.divf %182, %183 : vector<2x128xf32>
    %185 = vector.extract_strided_slice %184 {offsets = [0, 0], sizes = [2, 32], strides = [1, 1]} : vector<2x128xf32> to vector<2x32xf32>
    %186 = vector.extract_strided_slice %184 {offsets = [0, 32], sizes = [2, 32], strides = [1, 1]} : vector<2x128xf32> to vector<2x32xf32>
    %187 = vector.extract_strided_slice %184 {offsets = [0, 64], sizes = [2, 32], strides = [1, 1]} : vector<2x128xf32> to vector<2x32xf32>
    %cst_114 = arith.constant 2.000000e+00 : f32
    %188 = vector.broadcast %cst_114 : f32 to vector<2x32xf32>
    %189 = arith.mulf %188, %187 : vector<2x32xf32>
    %cst_115 = arith.constant 1.000000e+00 : f32
    %190 = vector.broadcast %cst_115 : f32 to vector<2x32xf32>
    %191 = arith.subf %189, %190 : vector<2x32xf32>
    %192 = vector.extract_strided_slice %184 {offsets = [0, 96], sizes = [2, 32], strides = [1, 1]} : vector<2x128xf32> to vector<2x32xf32>
    %193 = arith.mulf %186, %145 : vector<2x32xf32>
    %194 = arith.mulf %185, %191 : vector<2x32xf32>
    %195 = arith.addf %193, %194 : vector<2x32xf32>
    %196 = math.tanh %195 : vector<2x32xf32>
    %197 = arith.mulf %192, %196 : vector<2x32xf32>
    %198 = arith.negf %179 : vector<2x128xf32>
    %199 = math.exp %198 : vector<2x128xf32>
    %cst_116 = arith.constant 1.000000e+00 : f32
    %200 = vector.broadcast %cst_116 : f32 to vector<2x128xf32>
    %201 = arith.addf %200, %199 : vector<2x128xf32>
    %202 = arith.divf %200, %201 : vector<2x128xf32>
    %203 = vector.extract_strided_slice %202 {offsets = [0, 0], sizes = [2, 32], strides = [1, 1]} : vector<2x128xf32> to vector<2x32xf32>
    %204 = vector.extract_strided_slice %202 {offsets = [0, 32], sizes = [2, 32], strides = [1, 1]} : vector<2x128xf32> to vector<2x32xf32>
    %205 = vector.extract_strided_slice %202 {offsets = [0, 64], sizes = [2, 32], strides = [1, 1]} : vector<2x128xf32> to vector<2x32xf32>
    %cst_117 = arith.constant 2.000000e+00 : f32
    %206 = vector.broadcast %cst_117 : f32 to vector<2x32xf32>
    %207 = arith.mulf %206, %205 : vector<2x32xf32>
    %cst_118 = arith.constant 1.000000e+00 : f32
    %208 = vector.broadcast %cst_118 : f32 to vector<2x32xf32>
    %209 = arith.subf %207, %208 : vector<2x32xf32>
    %210 = vector.extract_strided_slice %202 {offsets = [0, 96], sizes = [2, 32], strides = [1, 1]} : vector<2x128xf32> to vector<2x32xf32>
    %211 = arith.mulf %204, %163 : vector<2x32xf32>
    %212 = arith.mulf %203, %209 : vector<2x32xf32>
    %213 = arith.addf %211, %212 : vector<2x32xf32>
    %214 = math.tanh %213 : vector<2x32xf32>
    %215 = arith.mulf %210, %214 : vector<2x32xf32>
    %c1_i32_119 = arith.constant 1 : i32
    %216 = arith.subi %c2_i32, %c1_i32_119 : i32
    %217 = arith.index_cast %216 : i32 to index
    %c0_120 = arith.constant 0 : index
    %c0_121 = arith.constant 0 : index
    %218 = vector.load %arg10[%217, %c0_120, %c0_121] : memref<8x2x32xf32, #tpu.memory_space<vmem>>, vector<1x2x32xf32>
    %219 = vector.shape_cast %218 : vector<1x2x32xf32> to vector<2x32xf32>
    %220 = vector.shape_cast %215 : vector<2x32xf32> to vector<1x2x32xf32>
    tpu.vector_store %arg10[%217, %c0_120, %c0_121], %220 {strides = array<i32>} : memref<8x2x32xf32, #tpu.memory_space<vmem>>, vector<1x2x32xf32>,
    %c3_i32 = arith.constant 3 : i32
    %221 = tpu.concatenate %197, %215 in 1 : vector<2x32xf32>, vector<2x32xf32> -> vector<2x64xf32>
    %cst_122 = arith.constant dense<0.000000e+00> : vector<2x256xf32>
    %222 = tpu.matmul %221, %96, %cst_122 {dimension_numbers = #tpu.dot_dimension_numbers<[1], [0], [0], [1], [0, 0, 1, 1], [], []>} : vector<2x64xf32>, vector<64x256xf32>, vector<2x256xf32> -> vector<2x256xf32>
    %223 = vector.extract_strided_slice %222 {offsets = [0, 0], sizes = [2, 128], strides = [1, 1]} : vector<2x256xf32> to vector<2x128xf32>
    %224 = arith.index_cast %c3_i32 : i32 to index
    %c0_123 = arith.constant 0 : index
    %c0_124 = arith.constant 0 : index
    %225 = vector.load %arg9[%224, %c0_123, %c0_124] : memref<8x2x128xf32, #tpu.memory_space<vmem>>, vector<1x2x128xf32>
    %226 = vector.shape_cast %225 : vector<1x2x128xf32> to vector<2x128xf32>
    %227 = arith.addf %223, %226 : vector<2x128xf32>
    %228 = vector.extract_strided_slice %222 {offsets = [0, 128], sizes = [2, 128], strides = [1, 1]} : vector<2x256xf32> to vector<2x128xf32>
    %229 = arith.addf %228, %99 : vector<2x128xf32>
    %230 = arith.negf %227 : vector<2x128xf32>
    %231 = math.exp %230 : vector<2x128xf32>
    %cst_125 = arith.constant 1.000000e+00 : f32
    %232 = vector.broadcast %cst_125 : f32 to vector<2x128xf32>
    %233 = arith.addf %232, %231 : vector<2x128xf32>
    %234 = arith.divf %232, %233 : vector<2x128xf32>
    %235 = vector.extract_strided_slice %234 {offsets = [0, 0], sizes = [2, 32], strides = [1, 1]} : vector<2x128xf32> to vector<2x32xf32>
    %236 = vector.extract_strided_slice %234 {offsets = [0, 32], sizes = [2, 32], strides = [1, 1]} : vector<2x128xf32> to vector<2x32xf32>
    %237 = vector.extract_strided_slice %234 {offsets = [0, 64], sizes = [2, 32], strides = [1, 1]} : vector<2x128xf32> to vector<2x32xf32>
    %cst_126 = arith.constant 2.000000e+00 : f32
    %238 = vector.broadcast %cst_126 : f32 to vector<2x32xf32>
    %239 = arith.mulf %238, %237 : vector<2x32xf32>
    %cst_127 = arith.constant 1.000000e+00 : f32
    %240 = vector.broadcast %cst_127 : f32 to vector<2x32xf32>
    %241 = arith.subf %239, %240 : vector<2x32xf32>
    %242 = vector.extract_strided_slice %234 {offsets = [0, 96], sizes = [2, 32], strides = [1, 1]} : vector<2x128xf32> to vector<2x32xf32>
    %243 = arith.mulf %236, %195 : vector<2x32xf32>
    %244 = arith.mulf %235, %241 : vector<2x32xf32>
    %245 = arith.addf %243, %244 : vector<2x32xf32>
    %246 = math.tanh %245 : vector<2x32xf32>
    %247 = arith.mulf %242, %246 : vector<2x32xf32>
    %248 = arith.negf %229 : vector<2x128xf32>
    %249 = math.exp %248 : vector<2x128xf32>
    %cst_128 = arith.constant 1.000000e+00 : f32
    %250 = vector.broadcast %cst_128 : f32 to vector<2x128xf32>
    %251 = arith.addf %250, %249 : vector<2x128xf32>
    %252 = arith.divf %250, %251 : vector<2x128xf32>
    %253 = vector.extract_strided_slice %252 {offsets = [0, 0], sizes = [2, 32], strides = [1, 1]} : vector<2x128xf32> to vector<2x32xf32>
    %254 = vector.extract_strided_slice %252 {offsets = [0, 32], sizes = [2, 32], strides = [1, 1]} : vector<2x128xf32> to vector<2x32xf32>
    %255 = vector.extract_strided_slice %252 {offsets = [0, 64], sizes = [2, 32], strides = [1, 1]} : vector<2x128xf32> to vector<2x32xf32>
    %cst_129 = arith.constant 2.000000e+00 : f32
    %256 = vector.broadcast %cst_129 : f32 to vector<2x32xf32>
    %257 = arith.mulf %256, %255 : vector<2x32xf32>
    %cst_130 = arith.constant 1.000000e+00 : f32
    %258 = vector.broadcast %cst_130 : f32 to vector<2x32xf32>
    %259 = arith.subf %257, %258 : vector<2x32xf32>
    %260 = vector.extract_strided_slice %252 {offsets = [0, 96], sizes = [2, 32], strides = [1, 1]} : vector<2x128xf32> to vector<2x32xf32>
    %261 = arith.mulf %254, %213 : vector<2x32xf32>
    %262 = arith.mulf %253, %259 : vector<2x32xf32>
    %263 = arith.addf %261, %262 : vector<2x32xf32>
    %264 = math.tanh %263 : vector<2x32xf32>
    %265 = arith.mulf %260, %264 : vector<2x32xf32>
    %c1_i32_131 = arith.constant 1 : i32
    %266 = arith.subi %c3_i32, %c1_i32_131 : i32
    %267 = arith.index_cast %266 : i32 to index
    %c0_132 = arith.constant 0 : index
    %c0_133 = arith.constant 0 : index
    %268 = vector.load %arg10[%267, %c0_132, %c0_133] : memref<8x2x32xf32, #tpu.memory_space<vmem>>, vector<1x2x32xf32>
    %269 = vector.shape_cast %268 : vector<1x2x32xf32> to vector<2x32xf32>
    %270 = vector.shape_cast %265 : vector<2x32xf32> to vector<1x2x32xf32>
    tpu.vector_store %arg10[%267, %c0_132, %c0_133], %270 {strides = array<i32>} : memref<8x2x32xf32, #tpu.memory_space<vmem>>, vector<1x2x32xf32>,
    %c4_i32 = arith.constant 4 : i32
    %271 = tpu.concatenate %247, %265 in 1 : vector<2x32xf32>, vector<2x32xf32> -> vector<2x64xf32>
    %cst_134 = arith.constant dense<0.000000e+00> : vector<2x256xf32>
    %272 = tpu.matmul %271, %96, %cst_134 {dimension_numbers = #tpu.dot_dimension_numbers<[1], [0], [0], [1], [0, 0, 1, 1], [], []>} : vector<2x64xf32>, vector<64x256xf32>, vector<2x256xf32> -> vector<2x256xf32>
    %273 = vector.extract_strided_slice %272 {offsets = [0, 0], sizes = [2, 128], strides = [1, 1]} : vector<2x256xf32> to vector<2x128xf32>
    %274 = arith.index_cast %c4_i32 : i32 to index
    %c0_135 = arith.constant 0 : index
    %c0_136 = arith.constant 0 : index
    %275 = vector.load %arg9[%274, %c0_135, %c0_136] : memref<8x2x128xf32, #tpu.memory_space<vmem>>, vector<1x2x128xf32>
    %276 = vector.shape_cast %275 : vector<1x2x128xf32> to vector<2x128xf32>
    %277 = arith.addf %273, %276 : vector<2x128xf32>
    %278 = vector.extract_strided_slice %272 {offsets = [0, 128], sizes = [2, 128], strides = [1, 1]} : vector<2x256xf32> to vector<2x128xf32>
    %279 = arith.addf %278, %99 : vector<2x128xf32>
    %280 = arith.negf %277 : vector<2x128xf32>
    %281 = math.exp %280 : vector<2x128xf32>
    %cst_137 = arith.constant 1.000000e+00 : f32
    %282 = vector.broadcast %cst_137 : f32 to vector<2x128xf32>
    %283 = arith.addf %282, %281 : vector<2x128xf32>
    %284 = arith.divf %282, %283 : vector<2x128xf32>
    %285 = vector.extract_strided_slice %284 {offsets = [0, 0], sizes = [2, 32], strides = [1, 1]} : vector<2x128xf32> to vector<2x32xf32>
    %286 = vector.extract_strided_slice %284 {offsets = [0, 32], sizes = [2, 32], strides = [1, 1]} : vector<2x128xf32> to vector<2x32xf32>
    %287 = vector.extract_strided_slice %284 {offsets = [0, 64], sizes = [2, 32], strides = [1, 1]} : vector<2x128xf32> to vector<2x32xf32>
    %cst_138 = arith.constant 2.000000e+00 : f32
    %288 = vector.broadcast %cst_138 : f32 to vector<2x32xf32>
    %289 = arith.mulf %288, %287 : vector<2x32xf32>
    %cst_139 = arith.constant 1.000000e+00 : f32
    %290 = vector.broadcast %cst_139 : f32 to vector<2x32xf32>
    %291 = arith.subf %289, %290 : vector<2x32xf32>
    %292 = vector.extract_strided_slice %284 {offsets = [0, 96], sizes = [2, 32], strides = [1, 1]} : vector<2x128xf32> to vector<2x32xf32>
    %293 = arith.mulf %286, %245 : vector<2x32xf32>
    %294 = arith.mulf %285, %291 : vector<2x32xf32>
    %295 = arith.addf %293, %294 : vector<2x32xf32>
    %296 = math.tanh %295 : vector<2x32xf32>
    %297 = arith.mulf %292, %296 : vector<2x32xf32>
    %298 = arith.negf %279 : vector<2x128xf32>
    %299 = math.exp %298 : vector<2x128xf32>
    %cst_140 = arith.constant 1.000000e+00 : f32
    %300 = vector.broadcast %cst_140 : f32 to vector<2x128xf32>
    %301 = arith.addf %300, %299 : vector<2x128xf32>
    %302 = arith.divf %300, %301 : vector<2x128xf32>
    %303 = vector.extract_strided_slice %302 {offsets = [0, 0], sizes = [2, 32], strides = [1, 1]} : vector<2x128xf32> to vector<2x32xf32>
    %304 = vector.extract_strided_slice %302 {offsets = [0, 32], sizes = [2, 32], strides = [1, 1]} : vector<2x128xf32> to vector<2x32xf32>
    %305 = vector.extract_strided_slice %302 {offsets = [0, 64], sizes = [2, 32], strides = [1, 1]} : vector<2x128xf32> to vector<2x32xf32>
    %cst_141 = arith.constant 2.000000e+00 : f32
    %306 = vector.broadcast %cst_141 : f32 to vector<2x32xf32>
    %307 = arith.mulf %306, %305 : vector<2x32xf32>
    %cst_142 = arith.constant 1.000000e+00 : f32
    %308 = vector.broadcast %cst_142 : f32 to vector<2x32xf32>
    %309 = arith.subf %307, %308 : vector<2x32xf32>
    %310 = vector.extract_strided_slice %302 {offsets = [0, 96], sizes = [2, 32], strides = [1, 1]} : vector<2x128xf32> to vector<2x32xf32>
    %311 = arith.mulf %304, %263 : vector<2x32xf32>
    %312 = arith.mulf %303, %309 : vector<2x32xf32>
    %313 = arith.addf %311, %312 : vector<2x32xf32>
    %314 = math.tanh %313 : vector<2x32xf32>
    %315 = arith.mulf %310, %314 : vector<2x32xf32>
    %c1_i32_143 = arith.constant 1 : i32
    %316 = arith.subi %c4_i32, %c1_i32_143 : i32
    %317 = arith.index_cast %316 : i32 to index
    %c0_144 = arith.constant 0 : index
    %c0_145 = arith.constant 0 : index
    %318 = vector.load %arg10[%317, %c0_144, %c0_145] : memref<8x2x32xf32, #tpu.memory_space<vmem>>, vector<1x2x32xf32>
    %319 = vector.shape_cast %318 : vector<1x2x32xf32> to vector<2x32xf32>
    %320 = vector.shape_cast %315 : vector<2x32xf32> to vector<1x2x32xf32>
    tpu.vector_store %arg10[%317, %c0_144, %c0_145], %320 {strides = array<i32>} : memref<8x2x32xf32, #tpu.memory_space<vmem>>, vector<1x2x32xf32>,
    %c5_i32 = arith.constant 5 : i32
    %321 = tpu.concatenate %297, %315 in 1 : vector<2x32xf32>, vector<2x32xf32> -> vector<2x64xf32>
    %cst_146 = arith.constant dense<0.000000e+00> : vector<2x256xf32>
    %322 = tpu.matmul %321, %96, %cst_146 {dimension_numbers = #tpu.dot_dimension_numbers<[1], [0], [0], [1], [0, 0, 1, 1], [], []>} : vector<2x64xf32>, vector<64x256xf32>, vector<2x256xf32> -> vector<2x256xf32>
    %323 = vector.extract_strided_slice %322 {offsets = [0, 0], sizes = [2, 128], strides = [1, 1]} : vector<2x256xf32> to vector<2x128xf32>
    %324 = arith.index_cast %c5_i32 : i32 to index
    %c0_147 = arith.constant 0 : index
    %c0_148 = arith.constant 0 : index
    %325 = vector.load %arg9[%324, %c0_147, %c0_148] : memref<8x2x128xf32, #tpu.memory_space<vmem>>, vector<1x2x128xf32>
    %326 = vector.shape_cast %325 : vector<1x2x128xf32> to vector<2x128xf32>
    %327 = arith.addf %323, %326 : vector<2x128xf32>
    %328 = vector.extract_strided_slice %322 {offsets = [0, 128], sizes = [2, 128], strides = [1, 1]} : vector<2x256xf32> to vector<2x128xf32>
    %329 = arith.addf %328, %99 : vector<2x128xf32>
    %330 = arith.negf %327 : vector<2x128xf32>
    %331 = math.exp %330 : vector<2x128xf32>
    %cst_149 = arith.constant 1.000000e+00 : f32
    %332 = vector.broadcast %cst_149 : f32 to vector<2x128xf32>
    %333 = arith.addf %332, %331 : vector<2x128xf32>
    %334 = arith.divf %332, %333 : vector<2x128xf32>
    %335 = vector.extract_strided_slice %334 {offsets = [0, 0], sizes = [2, 32], strides = [1, 1]} : vector<2x128xf32> to vector<2x32xf32>
    %336 = vector.extract_strided_slice %334 {offsets = [0, 32], sizes = [2, 32], strides = [1, 1]} : vector<2x128xf32> to vector<2x32xf32>
    %337 = vector.extract_strided_slice %334 {offsets = [0, 64], sizes = [2, 32], strides = [1, 1]} : vector<2x128xf32> to vector<2x32xf32>
    %cst_150 = arith.constant 2.000000e+00 : f32
    %338 = vector.broadcast %cst_150 : f32 to vector<2x32xf32>
    %339 = arith.mulf %338, %337 : vector<2x32xf32>
    %cst_151 = arith.constant 1.000000e+00 : f32
    %340 = vector.broadcast %cst_151 : f32 to vector<2x32xf32>
    %341 = arith.subf %339, %340 : vector<2x32xf32>
    %342 = vector.extract_strided_slice %334 {offsets = [0, 96], sizes = [2, 32], strides = [1, 1]} : vector<2x128xf32> to vector<2x32xf32>
    %343 = arith.mulf %336, %295 : vector<2x32xf32>
    %344 = arith.mulf %335, %341 : vector<2x32xf32>
    %345 = arith.addf %343, %344 : vector<2x32xf32>
    %346 = math.tanh %345 : vector<2x32xf32>
    %347 = arith.mulf %342, %346 : vector<2x32xf32>
    %348 = arith.negf %329 : vector<2x128xf32>
    %349 = math.exp %348 : vector<2x128xf32>
    %cst_152 = arith.constant 1.000000e+00 : f32
    %350 = vector.broadcast %cst_152 : f32 to vector<2x128xf32>
    %351 = arith.addf %350, %349 : vector<2x128xf32>
    %352 = arith.divf %350, %351 : vector<2x128xf32>
    %353 = vector.extract_strided_slice %352 {offsets = [0, 0], sizes = [2, 32], strides = [1, 1]} : vector<2x128xf32> to vector<2x32xf32>
    %354 = vector.extract_strided_slice %352 {offsets = [0, 32], sizes = [2, 32], strides = [1, 1]} : vector<2x128xf32> to vector<2x32xf32>
    %355 = vector.extract_strided_slice %352 {offsets = [0, 64], sizes = [2, 32], strides = [1, 1]} : vector<2x128xf32> to vector<2x32xf32>
    %cst_153 = arith.constant 2.000000e+00 : f32
    %356 = vector.broadcast %cst_153 : f32 to vector<2x32xf32>
    %357 = arith.mulf %356, %355 : vector<2x32xf32>
    %cst_154 = arith.constant 1.000000e+00 : f32
    %358 = vector.broadcast %cst_154 : f32 to vector<2x32xf32>
    %359 = arith.subf %357, %358 : vector<2x32xf32>
    %360 = vector.extract_strided_slice %352 {offsets = [0, 96], sizes = [2, 32], strides = [1, 1]} : vector<2x128xf32> to vector<2x32xf32>
    %361 = arith.mulf %354, %313 : vector<2x32xf32>
    %362 = arith.mulf %353, %359 : vector<2x32xf32>
    %363 = arith.addf %361, %362 : vector<2x32xf32>
    %364 = math.tanh %363 : vector<2x32xf32>
    %365 = arith.mulf %360, %364 : vector<2x32xf32>
    %c1_i32_155 = arith.constant 1 : i32
    %366 = arith.subi %c5_i32, %c1_i32_155 : i32
    %367 = arith.index_cast %366 : i32 to index
    %c0_156 = arith.constant 0 : index
    %c0_157 = arith.constant 0 : index
    %368 = vector.load %arg10[%367, %c0_156, %c0_157] : memref<8x2x32xf32, #tpu.memory_space<vmem>>, vector<1x2x32xf32>
    %369 = vector.shape_cast %368 : vector<1x2x32xf32> to vector<2x32xf32>
    %370 = vector.shape_cast %365 : vector<2x32xf32> to vector<1x2x32xf32>
    tpu.vector_store %arg10[%367, %c0_156, %c0_157], %370 {strides = array<i32>} : memref<8x2x32xf32, #tpu.memory_space<vmem>>, vector<1x2x32xf32>,
    %c6_i32 = arith.constant 6 : i32
    %371 = tpu.concatenate %347, %365 in 1 : vector<2x32xf32>, vector<2x32xf32> -> vector<2x64xf32>
    %cst_158 = arith.constant dense<0.000000e+00> : vector<2x256xf32>
    %372 = tpu.matmul %371, %96, %cst_158 {dimension_numbers = #tpu.dot_dimension_numbers<[1], [0], [0], [1], [0, 0, 1, 1], [], []>} : vector<2x64xf32>, vector<64x256xf32>, vector<2x256xf32> -> vector<2x256xf32>
    %373 = vector.extract_strided_slice %372 {offsets = [0, 0], sizes = [2, 128], strides = [1, 1]} : vector<2x256xf32> to vector<2x128xf32>
    %374 = arith.index_cast %c6_i32 : i32 to index
    %c0_159 = arith.constant 0 : index
    %c0_160 = arith.constant 0 : index
    %375 = vector.load %arg9[%374, %c0_159, %c0_160] : memref<8x2x128xf32, #tpu.memory_space<vmem>>, vector<1x2x128xf32>
    %376 = vector.shape_cast %375 : vector<1x2x128xf32> to vector<2x128xf32>
    %377 = arith.addf %373, %376 : vector<2x128xf32>
    %378 = vector.extract_strided_slice %372 {offsets = [0, 128], sizes = [2, 128], strides = [1, 1]} : vector<2x256xf32> to vector<2x128xf32>
    %379 = arith.addf %378, %99 : vector<2x128xf32>
    %380 = arith.negf %377 : vector<2x128xf32>
    %381 = math.exp %380 : vector<2x128xf32>
    %cst_161 = arith.constant 1.000000e+00 : f32
    %382 = vector.broadcast %cst_161 : f32 to vector<2x128xf32>
    %383 = arith.addf %382, %381 : vector<2x128xf32>
    %384 = arith.divf %382, %383 : vector<2x128xf32>
    %385 = vector.extract_strided_slice %384 {offsets = [0, 0], sizes = [2, 32], strides = [1, 1]} : vector<2x128xf32> to vector<2x32xf32>
    %386 = vector.extract_strided_slice %384 {offsets = [0, 32], sizes = [2, 32], strides = [1, 1]} : vector<2x128xf32> to vector<2x32xf32>
    %387 = vector.extract_strided_slice %384 {offsets = [0, 64], sizes = [2, 32], strides = [1, 1]} : vector<2x128xf32> to vector<2x32xf32>
    %cst_162 = arith.constant 2.000000e+00 : f32
    %388 = vector.broadcast %cst_162 : f32 to vector<2x32xf32>
    %389 = arith.mulf %388, %387 : vector<2x32xf32>
    %cst_163 = arith.constant 1.000000e+00 : f32
    %390 = vector.broadcast %cst_163 : f32 to vector<2x32xf32>
    %391 = arith.subf %389, %390 : vector<2x32xf32>
    %392 = vector.extract_strided_slice %384 {offsets = [0, 96], sizes = [2, 32], strides = [1, 1]} : vector<2x128xf32> to vector<2x32xf32>
    %393 = arith.mulf %386, %345 : vector<2x32xf32>
    %394 = arith.mulf %385, %391 : vector<2x32xf32>
    %395 = arith.addf %393, %394 : vector<2x32xf32>
    %396 = math.tanh %395 : vector<2x32xf32>
    %397 = arith.mulf %392, %396 : vector<2x32xf32>
    %398 = arith.negf %379 : vector<2x128xf32>
    %399 = math.exp %398 : vector<2x128xf32>
    %cst_164 = arith.constant 1.000000e+00 : f32
    %400 = vector.broadcast %cst_164 : f32 to vector<2x128xf32>
    %401 = arith.addf %400, %399 : vector<2x128xf32>
    %402 = arith.divf %400, %401 : vector<2x128xf32>
    %403 = vector.extract_strided_slice %402 {offsets = [0, 0], sizes = [2, 32], strides = [1, 1]} : vector<2x128xf32> to vector<2x32xf32>
    %404 = vector.extract_strided_slice %402 {offsets = [0, 32], sizes = [2, 32], strides = [1, 1]} : vector<2x128xf32> to vector<2x32xf32>
    %405 = vector.extract_strided_slice %402 {offsets = [0, 64], sizes = [2, 32], strides = [1, 1]} : vector<2x128xf32> to vector<2x32xf32>
    %cst_165 = arith.constant 2.000000e+00 : f32
    %406 = vector.broadcast %cst_165 : f32 to vector<2x32xf32>
    %407 = arith.mulf %406, %405 : vector<2x32xf32>
    %cst_166 = arith.constant 1.000000e+00 : f32
    %408 = vector.broadcast %cst_166 : f32 to vector<2x32xf32>
    %409 = arith.subf %407, %408 : vector<2x32xf32>
    %410 = vector.extract_strided_slice %402 {offsets = [0, 96], sizes = [2, 32], strides = [1, 1]} : vector<2x128xf32> to vector<2x32xf32>
    %411 = arith.mulf %404, %363 : vector<2x32xf32>
    %412 = arith.mulf %403, %409 : vector<2x32xf32>
    %413 = arith.addf %411, %412 : vector<2x32xf32>
    %414 = math.tanh %413 : vector<2x32xf32>
    %415 = arith.mulf %410, %414 : vector<2x32xf32>
    %c1_i32_167 = arith.constant 1 : i32
    %416 = arith.subi %c6_i32, %c1_i32_167 : i32
    %417 = arith.index_cast %416 : i32 to index
    %c0_168 = arith.constant 0 : index
    %c0_169 = arith.constant 0 : index
    %418 = vector.load %arg10[%417, %c0_168, %c0_169] : memref<8x2x32xf32, #tpu.memory_space<vmem>>, vector<1x2x32xf32>
    %419 = vector.shape_cast %418 : vector<1x2x32xf32> to vector<2x32xf32>
    %420 = vector.shape_cast %415 : vector<2x32xf32> to vector<1x2x32xf32>
    tpu.vector_store %arg10[%417, %c0_168, %c0_169], %420 {strides = array<i32>} : memref<8x2x32xf32, #tpu.memory_space<vmem>>, vector<1x2x32xf32>,
    %c7_i32 = arith.constant 7 : i32
    %421 = tpu.concatenate %397, %415 in 1 : vector<2x32xf32>, vector<2x32xf32> -> vector<2x64xf32>
    %cst_170 = arith.constant dense<0.000000e+00> : vector<2x256xf32>
    %422 = tpu.matmul %421, %96, %cst_170 {dimension_numbers = #tpu.dot_dimension_numbers<[1], [0], [0], [1], [0, 0, 1, 1], [], []>} : vector<2x64xf32>, vector<64x256xf32>, vector<2x256xf32> -> vector<2x256xf32>
    %423 = vector.extract_strided_slice %422 {offsets = [0, 0], sizes = [2, 128], strides = [1, 1]} : vector<2x256xf32> to vector<2x128xf32>
    %424 = arith.index_cast %c7_i32 : i32 to index
    %c0_171 = arith.constant 0 : index
    %c0_172 = arith.constant 0 : index
    %425 = vector.load %arg9[%424, %c0_171, %c0_172] : memref<8x2x128xf32, #tpu.memory_space<vmem>>, vector<1x2x128xf32>
    %426 = vector.shape_cast %425 : vector<1x2x128xf32> to vector<2x128xf32>
    %427 = arith.addf %423, %426 : vector<2x128xf32>
    %428 = vector.extract_strided_slice %422 {offsets = [0, 128], sizes = [2, 128], strides = [1, 1]} : vector<2x256xf32> to vector<2x128xf32>
    %429 = arith.addf %428, %99 : vector<2x128xf32>
    %430 = arith.negf %427 : vector<2x128xf32>
    %431 = math.exp %430 : vector<2x128xf32>
    %cst_173 = arith.constant 1.000000e+00 : f32
    %432 = vector.broadcast %cst_173 : f32 to vector<2x128xf32>
    %433 = arith.addf %432, %431 : vector<2x128xf32>
    %434 = arith.divf %432, %433 : vector<2x128xf32>
    %435 = vector.extract_strided_slice %434 {offsets = [0, 0], sizes = [2, 32], strides = [1, 1]} : vector<2x128xf32> to vector<2x32xf32>
    %436 = vector.extract_strided_slice %434 {offsets = [0, 32], sizes = [2, 32], strides = [1, 1]} : vector<2x128xf32> to vector<2x32xf32>
    %437 = vector.extract_strided_slice %434 {offsets = [0, 64], sizes = [2, 32], strides = [1, 1]} : vector<2x128xf32> to vector<2x32xf32>
    %cst_174 = arith.constant 2.000000e+00 : f32
    %438 = vector.broadcast %cst_174 : f32 to vector<2x32xf32>
    %439 = arith.mulf %438, %437 : vector<2x32xf32>
    %cst_175 = arith.constant 1.000000e+00 : f32
    %440 = vector.broadcast %cst_175 : f32 to vector<2x32xf32>
    %441 = arith.subf %439, %440 : vector<2x32xf32>
    %442 = vector.extract_strided_slice %434 {offsets = [0, 96], sizes = [2, 32], strides = [1, 1]} : vector<2x128xf32> to vector<2x32xf32>
    %443 = arith.mulf %436, %395 : vector<2x32xf32>
    %444 = arith.mulf %435, %441 : vector<2x32xf32>
    %445 = arith.addf %443, %444 : vector<2x32xf32>
    %446 = math.tanh %445 : vector<2x32xf32>
    %447 = arith.mulf %442, %446 : vector<2x32xf32>
    %448 = arith.negf %429 : vector<2x128xf32>
    %449 = math.exp %448 : vector<2x128xf32>
    %cst_176 = arith.constant 1.000000e+00 : f32
    %450 = vector.broadcast %cst_176 : f32 to vector<2x128xf32>
    %451 = arith.addf %450, %449 : vector<2x128xf32>
    %452 = arith.divf %450, %451 : vector<2x128xf32>
    %453 = vector.extract_strided_slice %452 {offsets = [0, 0], sizes = [2, 32], strides = [1, 1]} : vector<2x128xf32> to vector<2x32xf32>
    %454 = vector.extract_strided_slice %452 {offsets = [0, 32], sizes = [2, 32], strides = [1, 1]} : vector<2x128xf32> to vector<2x32xf32>
    %455 = vector.extract_strided_slice %452 {offsets = [0, 64], sizes = [2, 32], strides = [1, 1]} : vector<2x128xf32> to vector<2x32xf32>
    %cst_177 = arith.constant 2.000000e+00 : f32
    %456 = vector.broadcast %cst_177 : f32 to vector<2x32xf32>
    %457 = arith.mulf %456, %455 : vector<2x32xf32>
    %cst_178 = arith.constant 1.000000e+00 : f32
    %458 = vector.broadcast %cst_178 : f32 to vector<2x32xf32>
    %459 = arith.subf %457, %458 : vector<2x32xf32>
    %460 = vector.extract_strided_slice %452 {offsets = [0, 96], sizes = [2, 32], strides = [1, 1]} : vector<2x128xf32> to vector<2x32xf32>
    %461 = arith.mulf %454, %413 : vector<2x32xf32>
    %462 = arith.mulf %453, %459 : vector<2x32xf32>
    %463 = arith.addf %461, %462 : vector<2x32xf32>
    %464 = math.tanh %463 : vector<2x32xf32>
    %465 = arith.mulf %460, %464 : vector<2x32xf32>
    %c1_i32_179 = arith.constant 1 : i32
    %466 = arith.subi %c7_i32, %c1_i32_179 : i32
    %467 = arith.index_cast %466 : i32 to index
    %c0_180 = arith.constant 0 : index
    %c0_181 = arith.constant 0 : index
    %468 = vector.load %arg10[%467, %c0_180, %c0_181] : memref<8x2x32xf32, #tpu.memory_space<vmem>>, vector<1x2x32xf32>
    %469 = vector.shape_cast %468 : vector<1x2x32xf32> to vector<2x32xf32>
    %470 = vector.shape_cast %465 : vector<2x32xf32> to vector<1x2x32xf32>
    tpu.vector_store %arg10[%467, %c0_180, %c0_181], %470 {strides = array<i32>} : memref<8x2x32xf32, #tpu.memory_space<vmem>>, vector<1x2x32xf32>,
    %c7_i32_182 = arith.constant 7 : i32
    %471 = tpu.concatenate %447, %465 in 1 : vector<2x32xf32>, vector<2x32xf32> -> vector<2x64xf32>
    %cst_183 = arith.constant dense<0.000000e+00> : vector<2x256xf32>
    %472 = tpu.matmul %471, %96, %cst_183 {dimension_numbers = #tpu.dot_dimension_numbers<[1], [0], [0], [1], [0, 0, 1, 1], [], []>} : vector<2x64xf32>, vector<64x256xf32>, vector<2x256xf32> -> vector<2x256xf32>
    %473 = vector.extract_strided_slice %472 {offsets = [0, 128], sizes = [2, 128], strides = [1, 1]} : vector<2x256xf32> to vector<2x128xf32>
    %474 = arith.addf %473, %99 : vector<2x128xf32>
    %475 = arith.negf %474 : vector<2x128xf32>
    %476 = math.exp %475 : vector<2x128xf32>
    %cst_184 = arith.constant 1.000000e+00 : f32
    %477 = vector.broadcast %cst_184 : f32 to vector<2x128xf32>
    %478 = arith.addf %477, %476 : vector<2x128xf32>
    %479 = arith.divf %477, %478 : vector<2x128xf32>
    %480 = vector.extract_strided_slice %479 {offsets = [0, 0], sizes = [2, 32], strides = [1, 1]} : vector<2x128xf32> to vector<2x32xf32>
    %481 = vector.extract_strided_slice %479 {offsets = [0, 32], sizes = [2, 32], strides = [1, 1]} : vector<2x128xf32> to vector<2x32xf32>
    %482 = vector.extract_strided_slice %479 {offsets = [0, 64], sizes = [2, 32], strides = [1, 1]} : vector<2x128xf32> to vector<2x32xf32>
    %cst_185 = arith.constant 2.000000e+00 : f32
    %483 = vector.broadcast %cst_185 : f32 to vector<2x32xf32>
    %484 = arith.mulf %483, %482 : vector<2x32xf32>
    %cst_186 = arith.constant 1.000000e+00 : f32
    %485 = vector.broadcast %cst_186 : f32 to vector<2x32xf32>
    %486 = arith.subf %484, %485 : vector<2x32xf32>
    %487 = vector.extract_strided_slice %479 {offsets = [0, 96], sizes = [2, 32], strides = [1, 1]} : vector<2x128xf32> to vector<2x32xf32>
    %488 = arith.mulf %481, %463 : vector<2x32xf32>
    %489 = arith.mulf %480, %486 : vector<2x32xf32>
    %490 = arith.addf %488, %489 : vector<2x32xf32>
    %491 = math.tanh %490 : vector<2x32xf32>
    %492 = arith.mulf %487, %491 : vector<2x32xf32>
    %c7_187 = arith.constant 7 : index
    %c0_188 = arith.constant 0 : index
    %c0_189 = arith.constant 0 : index
    %493 = vector.load %arg10[%c7_187, %c0_188, %c0_189] : memref<8x2x32xf32, #tpu.memory_space<vmem>>, vector<1x2x32xf32>
    %494 = vector.shape_cast %493 : vector<1x2x32xf32> to vector<2x32xf32>
    %495 = vector.shape_cast %492 : vector<2x32xf32> to vector<1x2x32xf32>
    tpu.vector_store %arg10[%c7_187, %c0_188, %c0_189], %495 {strides = array<i32>} : memref<8x2x32xf32, #tpu.memory_space<vmem>>, vector<1x2x32xf32>,
    %c0_190 = arith.constant 0 : index
    %c0_191 = arith.constant 0 : index
    %c0_192 = arith.constant 0 : index
    %496 = vector.load %arg7[%c0_190, %c0_191, %c0_192] : memref<2x2x32xf32, #tpu.memory_space<vmem>>, vector<1x2x32xf32>
    %497 = vector.shape_cast %496 : vector<1x2x32xf32> to vector<2x32xf32>
    %498 = vector.shape_cast %447 : vector<2x32xf32> to vector<1x2x32xf32>
    tpu.vector_store %arg7[%c0_190, %c0_191, %c0_192], %498 {strides = array<i32>} : memref<2x2x32xf32, #tpu.memory_space<vmem>>, vector<1x2x32xf32>,
    %c1_193 = arith.constant 1 : index
    %c0_194 = arith.constant 0 : index
    %c0_195 = arith.constant 0 : index
    %499 = vector.load %arg7[%c1_193, %c0_194, %c0_195] : memref<2x2x32xf32, #tpu.memory_space<vmem>>, vector<1x2x32xf32>
    %500 = vector.shape_cast %499 : vector<1x2x32xf32> to vector<2x32xf32>
    %501 = vector.shape_cast %492 : vector<2x32xf32> to vector<1x2x32xf32>
    tpu.vector_store %arg7[%c1_193, %c0_194, %c0_195], %501 {strides = array<i32>} : memref<2x2x32xf32, #tpu.memory_space<vmem>>, vector<1x2x32xf32>,
    %c0_196 = arith.constant 0 : index
    %c0_197 = arith.constant 0 : index
    %c0_198 = arith.constant 0 : index
    %502 = vector.load %arg8[%c0_196, %c0_197, %c0_198] : memref<2x2x32xf32, #tpu.memory_space<vmem>>, vector<1x2x32xf32>
    %503 = vector.shape_cast %502 : vector<1x2x32xf32> to vector<2x32xf32>
    %504 = vector.shape_cast %445 : vector<2x32xf32> to vector<1x2x32xf32>
    tpu.vector_store %arg8[%c0_196, %c0_197, %c0_198], %504 {strides = array<i32>} : memref<2x2x32xf32, #tpu.memory_space<vmem>>, vector<1x2x32xf32>,
    %c1_199 = arith.constant 1 : index
    %c0_200 = arith.constant 0 : index
    %c0_201 = arith.constant 0 : index
    %505 = vector.load %arg8[%c1_199, %c0_200, %c0_201] : memref<2x2x32xf32, #tpu.memory_space<vmem>>, vector<1x2x32xf32>
    %506 = vector.shape_cast %505 : vector<1x2x32xf32> to vector<2x32xf32>
    %507 = vector.shape_cast %490 : vector<2x32xf32> to vector<1x2x32xf32>
    tpu.vector_store %arg8[%c1_199, %c0_200, %c0_201], %507 {strides = array<i32>} : memref<2x2x32xf32, #tpu.memory_space<vmem>>, vector<1x2x32xf32>,
    %c0_202 = arith.constant 0 : index
    %c0_203 = arith.constant 0 : index
    %508 = vector.load %arg4[%c0_202, %c0_203] : memref<32x28xf32, #tpu.memory_space<vmem>>, vector<32x28xf32>
    %c0_204 = arith.constant 0 : index
    %c0_205 = arith.constant 0 : index
    %509 = vector.load %arg5[%c0_204, %c0_205] : memref<1x28xf32, #tpu.memory_space<vmem>>, vector<1x28xf32>
    %c0_206 = arith.constant 0 : index
    %c0_207 = arith.constant 0 : index
    %c0_208 = arith.constant 0 : index
    %510 = vector.load %arg10[%c0_206, %c0_207, %c0_208] : memref<8x2x32xf32, #tpu.memory_space<vmem>>, vector<1x1x32xf32>
    %511 = vector.shape_cast %510 : vector<1x1x32xf32> to vector<1x32xf32>
    %c1_209 = arith.constant 1 : index
    %c0_210 = arith.constant 0 : index
    %c0_211 = arith.constant 0 : index
    %512 = vector.load %arg10[%c1_209, %c0_210, %c0_211] : memref<8x2x32xf32, #tpu.memory_space<vmem>>, vector<1x1x32xf32>
    %513 = vector.shape_cast %512 : vector<1x1x32xf32> to vector<1x32xf32>
    %c2_212 = arith.constant 2 : index
    %c0_213 = arith.constant 0 : index
    %c0_214 = arith.constant 0 : index
    %514 = vector.load %arg10[%c2_212, %c0_213, %c0_214] : memref<8x2x32xf32, #tpu.memory_space<vmem>>, vector<1x1x32xf32>
    %515 = vector.shape_cast %514 : vector<1x1x32xf32> to vector<1x32xf32>
    %c3_215 = arith.constant 3 : index
    %c0_216 = arith.constant 0 : index
    %c0_217 = arith.constant 0 : index
    %516 = vector.load %arg10[%c3_215, %c0_216, %c0_217] : memref<8x2x32xf32, #tpu.memory_space<vmem>>, vector<1x1x32xf32>
    %517 = vector.shape_cast %516 : vector<1x1x32xf32> to vector<1x32xf32>
    %c4_218 = arith.constant 4 : index
    %c0_219 = arith.constant 0 : index
    %c0_220 = arith.constant 0 : index
    %518 = vector.load %arg10[%c4_218, %c0_219, %c0_220] : memref<8x2x32xf32, #tpu.memory_space<vmem>>, vector<1x1x32xf32>
    %519 = vector.shape_cast %518 : vector<1x1x32xf32> to vector<1x32xf32>
    %c5_221 = arith.constant 5 : index
    %c0_222 = arith.constant 0 : index
    %c0_223 = arith.constant 0 : index
    %520 = vector.load %arg10[%c5_221, %c0_222, %c0_223] : memref<8x2x32xf32, #tpu.memory_space<vmem>>, vector<1x1x32xf32>
    %521 = vector.shape_cast %520 : vector<1x1x32xf32> to vector<1x32xf32>
    %c6_224 = arith.constant 6 : index
    %c0_225 = arith.constant 0 : index
    %c0_226 = arith.constant 0 : index
    %522 = vector.load %arg10[%c6_224, %c0_225, %c0_226] : memref<8x2x32xf32, #tpu.memory_space<vmem>>, vector<1x1x32xf32>
    %523 = vector.shape_cast %522 : vector<1x1x32xf32> to vector<1x32xf32>
    %c7_227 = arith.constant 7 : index
    %c0_228 = arith.constant 0 : index
    %c0_229 = arith.constant 0 : index
    %524 = vector.load %arg10[%c7_227, %c0_228, %c0_229] : memref<8x2x32xf32, #tpu.memory_space<vmem>>, vector<1x1x32xf32>
    %525 = vector.shape_cast %524 : vector<1x1x32xf32> to vector<1x32xf32>
    %526 = tpu.concatenate %511, %513, %515, %517, %519, %521, %523, %525 in 0 : vector<1x32xf32>, vector<1x32xf32>, vector<1x32xf32>, vector<1x32xf32>, vector<1x32xf32>, vector<1x32xf32>, vector<1x32xf32>, vector<1x32xf32> -> vector<8x32xf32>
    %cst_230 = arith.constant dense<0.000000e+00> : vector<8x28xf32>
    %527 = tpu.matmul %526, %508, %cst_230 {dimension_numbers = #tpu.dot_dimension_numbers<[1], [0], [0], [1], [0, 0, 1, 1], [], []>} : vector<8x32xf32>, vector<32x28xf32>, vector<8x28xf32> -> vector<8x28xf32>
    %528 = vector.broadcast %509 : vector<1x28xf32> to vector<8x28xf32>
    %529 = arith.addf %527, %528 : vector<8x28xf32>
    %c0_231 = arith.constant 0 : index
    %c0_232 = arith.constant 0 : index
    %c0_233 = arith.constant 0 : index
    %530 = vector.load %arg6[%c0_231, %c0_232, %c0_233] : memref<2x8x28xf32, #tpu.memory_space<vmem>>, vector<1x8x28xf32>
    %531 = vector.shape_cast %530 : vector<1x8x28xf32> to vector<8x28xf32>
    %532 = vector.shape_cast %529 : vector<8x28xf32> to vector<1x8x28xf32>
    tpu.vector_store %arg6[%c0_231, %c0_232, %c0_233], %532 {strides = array<i32>} : memref<2x8x28xf32, #tpu.memory_space<vmem>>, vector<1x8x28xf32>,
    %c0_234 = arith.constant 0 : index
    %c1_235 = arith.constant 1 : index
    %c0_236 = arith.constant 0 : index
    %533 = vector.load %arg10[%c0_234, %c1_235, %c0_236] : memref<8x2x32xf32, #tpu.memory_space<vmem>>, vector<1x1x32xf32>
    %534 = vector.shape_cast %533 : vector<1x1x32xf32> to vector<1x32xf32>
    %c1_237 = arith.constant 1 : index
    %c1_238 = arith.constant 1 : index
    %c0_239 = arith.constant 0 : index
    %535 = vector.load %arg10[%c1_237, %c1_238, %c0_239] : memref<8x2x32xf32, #tpu.memory_space<vmem>>, vector<1x1x32xf32>
    %536 = vector.shape_cast %535 : vector<1x1x32xf32> to vector<1x32xf32>
    %c2_240 = arith.constant 2 : index
    %c1_241 = arith.constant 1 : index
    %c0_242 = arith.constant 0 : index
    %537 = vector.load %arg10[%c2_240, %c1_241, %c0_242] : memref<8x2x32xf32, #tpu.memory_space<vmem>>, vector<1x1x32xf32>
    %538 = vector.shape_cast %537 : vector<1x1x32xf32> to vector<1x32xf32>
    %c3_243 = arith.constant 3 : index
    %c1_244 = arith.constant 1 : index
    %c0_245 = arith.constant 0 : index
    %539 = vector.load %arg10[%c3_243, %c1_244, %c0_245] : memref<8x2x32xf32, #tpu.memory_space<vmem>>, vector<1x1x32xf32>
    %540 = vector.shape_cast %539 : vector<1x1x32xf32> to vector<1x32xf32>
    %c4_246 = arith.constant 4 : index
    %c1_247 = arith.constant 1 : index
    %c0_248 = arith.constant 0 : index
    %541 = vector.load %arg10[%c4_246, %c1_247, %c0_248] : memref<8x2x32xf32, #tpu.memory_space<vmem>>, vector<1x1x32xf32>
    %542 = vector.shape_cast %541 : vector<1x1x32xf32> to vector<1x32xf32>
    %c5_249 = arith.constant 5 : index
    %c1_250 = arith.constant 1 : index
    %c0_251 = arith.constant 0 : index
    %543 = vector.load %arg10[%c5_249, %c1_250, %c0_251] : memref<8x2x32xf32, #tpu.memory_space<vmem>>, vector<1x1x32xf32>
    %544 = vector.shape_cast %543 : vector<1x1x32xf32> to vector<1x32xf32>
    %c6_252 = arith.constant 6 : index
    %c1_253 = arith.constant 1 : index
    %c0_254 = arith.constant 0 : index
    %545 = vector.load %arg10[%c6_252, %c1_253, %c0_254] : memref<8x2x32xf32, #tpu.memory_space<vmem>>, vector<1x1x32xf32>
    %546 = vector.shape_cast %545 : vector<1x1x32xf32> to vector<1x32xf32>
    %c7_255 = arith.constant 7 : index
    %c1_256 = arith.constant 1 : index
    %c0_257 = arith.constant 0 : index
    %547 = vector.load %arg10[%c7_255, %c1_256, %c0_257] : memref<8x2x32xf32, #tpu.memory_space<vmem>>, vector<1x1x32xf32>
    %548 = vector.shape_cast %547 : vector<1x1x32xf32> to vector<1x32xf32>
    %549 = tpu.concatenate %534, %536, %538, %540, %542, %544, %546, %548 in 0 : vector<1x32xf32>, vector<1x32xf32>, vector<1x32xf32>, vector<1x32xf32>, vector<1x32xf32>, vector<1x32xf32>, vector<1x32xf32>, vector<1x32xf32> -> vector<8x32xf32>
    %cst_258 = arith.constant dense<0.000000e+00> : vector<8x28xf32>
    %550 = tpu.matmul %549, %508, %cst_258 {dimension_numbers = #tpu.dot_dimension_numbers<[1], [0], [0], [1], [0, 0, 1, 1], [], []>} : vector<8x32xf32>, vector<32x28xf32>, vector<8x28xf32> -> vector<8x28xf32>
    %551 = vector.broadcast %509 : vector<1x28xf32> to vector<8x28xf32>
    %552 = arith.addf %550, %551 : vector<8x28xf32>
    %c1_259 = arith.constant 1 : index
    %c0_260 = arith.constant 0 : index
    %c0_261 = arith.constant 0 : index
    %553 = vector.load %arg6[%c1_259, %c0_260, %c0_261] : memref<2x8x28xf32, #tpu.memory_space<vmem>>, vector<1x8x28xf32>
    %554 = vector.shape_cast %553 : vector<1x8x28xf32> to vector<8x28xf32>
    %555 = vector.shape_cast %552 : vector<8x28xf32> to vector<1x8x28xf32>
    tpu.vector_store %arg6[%c1_259, %c0_260, %c0_261], %555 {strides = array<i32>} : memref<2x8x28xf32, #tpu.memory_space<vmem>>, vector<1x8x28xf32>,
    return
  }
}

</mosaic_0001>

<bundles_post_ra>
// kernel: model_forward.1
= control target key start
LH: loop header
LB: loop body
LE: loop exit
PB: predicated region body
PF: predicated region fallthrough
CT: control target
= control target key end

     0   :  { %14 = vsyncpa [#allocation7], 0  ;;  %s2561_s0 = inlined_call_operand.hbm [shape: s32[2,8], index: 0, kind: input, shape index: {}]   ;;  %s2562_s1 = inlined_call_operand.hbm [shape: f32[28,128], index: 1, kind: input, shape index: {}]   ;;  %s2563_s2 = inlined_call_operand.hbm [shape: f32[64,256], index: 2, kind: input, shape index: {}]   ;;  %s2564_s3 = inlined_call_operand.vmem [shape: f32[1,128], index: 3, kind: input, shape index: {}]   ;;  %s2565_s4 = inlined_call_operand.hbm [shape: f32[32,28], index: 4, kind: input, shape index: {}]   ;;  %s2566_s5 = inlined_call_operand.vmem [shape: f32[1,28], index: 5, kind: input, shape index: {}]   ;;  %s2567_s6 = inlined_call_operand.hbm [shape: f32[2,8,28], index: 6, kind: output, shape index: {0}]   ;;  %s2568_s7 = inlined_call_operand.hbm [shape: f32[2,2,32], index: 7, kind: output, shape index: {1}]   ;;  %s2569_s8 = inlined_call_operand.hbm [shape: f32[2,2,32], index: 8, kind: output, shape index: {2}]  }
   0x1   :  { %15 = vsyncpa [#allocation5], 0 }
   0x2   :  { %16 = vsyncpa [#allocation10], 0 }
   0x3   :  { %17 = vsyncpa [#allocation6], 0 }
   0x4   :  { %18 = vsyncpa [#allocation14], 0  ;;  %s2116_s27 = smov [#allocation9]   ;;  %s1964_s9 = scalar_lea.hbm %s2563_s2, 2048 }
   0x5   :  { %s44_s28 = sshll.u32 %s2116_s27, 4  ;;  %p1965_p0 = scmp.ne.s32.totalorder %s2563_s2, %s1964_s9  ;;  %s45_s28 = int_to_ptr.vmem [resolvable:$true] %s44_s28 }
   0x6   :  { %p1968_p1 = scmp.lt.u32.totalorder %s1964_s9, %s2563_s2 }
   0x8   :  { %p1970_p2 = pnand %p1968_p1, %p1965_p0 }
   0xa   :  { %1973 = shalt.err (!%p1970_p2)
}
   0xb   :  { %s1974_s14 = scalar_lea.vmem %s45_s28, 2048  ;;  %p1979_p4 = scmp.lt.s32.totalorder %s45_s28, %s45_s28 }
   0xc   :  { %p1975_p3 = scmp.ne.s32.totalorder %s45_s28, %s1974_s14  ;;  %p1980_p5 = scmp.lt.s32.totalorder %s1974_s14, %s1974_s14 }
   0xe   :  { %p1981_p6 = por %p1980_p5, %p1979_p4 }
  0x10   :  { %p1982_p7 = pnand %p1981_p6, %p1975_p3 }
  0x12   :  { %1985 = shalt.err (!%p1982_p7)
}
  0x13   :  { %s2117_s15 = smov 256   ;;  %s2118_s16 = smov 16  }
  0x14   :  { %50 = dma.hbm_to_vmem [thread:$0]  %s2563_s2, 2048, %s45_s28, [#allocation10], %s2117_s15, %s2117_s15, %s2118_s16  }
  0x15   :  { %s1986_s21 = scalar_lea.hbm %s2561_s0, 32 }
  0x16   :  { %p1987_p8 = scmp.ne.s32.totalorder %s2561_s0, %s1986_s21  ;;  %p1990_p9 = scmp.lt.u32.totalorder %s1986_s21, %s2561_s0 }
  0x18   :  { %p1992_p10 = pnand %p1990_p9, %p1987_p8 }
  0x1a   :  { %1995 = shalt.err (!%p1992_p10)
}
  0x1b   :  { %s2119_s26 = smov [#allocation4]   ;;  %s2120_s2 = smov [#allocation8]  }
  0x1c   :  { %26 = dma.hbm_to_smem %s2561_s0, 32, %s2119_s26, [#allocation7]  }
  0x1d   :  { %s32_s28 = sshll.u32 %s2120_s2, 4  ;;  %s1996_s10 = scalar_lea.hbm %s2562_s1, 512  ;;  %s33_s28 = int_to_ptr.vmem [resolvable:$true] %s32_s28 }
  0x1e   :  { %p1997_p11 = scmp.ne.s32.totalorder %s2562_s1, %s1996_s10  ;;  %p2000_p12 = scmp.lt.u32.totalorder %s1996_s10, %s2562_s1 }
  0x20   :  { %p2002_p13 = pnand %p2000_p12, %p1997_p11 }
  0x22   :  { %2005 = shalt.err (!%p2002_p13)
}
  0x23   :  { %s2006_s15 = scalar_lea.vmem %s33_s28, 512  ;;  %p2011_p1 = scmp.lt.s32.totalorder %s33_s28, %s33_s28 }
  0x24   :  { %p2007_p0 = scmp.ne.s32.totalorder %s33_s28, %s2006_s15  ;;  %p2012_p2 = scmp.lt.s32.totalorder %s2006_s15, %s2006_s15 }
  0x26   :  { %p2013_p3 = por %p2012_p2, %p2011_p1 }
  0x28   :  { %p2014_p4 = pnand %p2013_p3, %p2007_p0 }
  0x2a   :  { %2017 = shalt.err (!%p2014_p4)
}
  0x2b   :  { %s2121_s0 = smov 128   ;;  %s2122_s16 = smov 8  }
  0x2c   :  { %38 = dma.hbm_to_vmem [thread:$0]  %s2562_s1, 512, %s33_s28, [#allocation5], %s2121_s0, %s2121_s0, %s2122_s16  }
  0x2d   :  { %s2123_s19 = smov [#allocation11]   ;;  %s2018_s23 = scalar_lea.hbm %s2565_s4, 512 }
  0x2e   :  { %s58_s20 = sshll.u32 %s2123_s19, 4  ;;  %p2019_p5 = scmp.ne.s32.totalorder %s2565_s4, %s2018_s23  ;;  %s59_s20 = int_to_ptr.vmem [resolvable:$true] %s58_s20 }
  0x2f   :  { %p2022_p6 = scmp.lt.u32.totalorder %s2018_s23, %s2565_s4 }
  0x31   :  { %p2024_p7 = pnand %p2022_p6, %p2019_p5 }
  0x33   :  { %2027 = shalt.err (!%p2024_p7)
}
  0x34   :  { %s2028_s29 = scalar_lea.vmem %s59_s20, 512  ;;  %p2033_p9 = scmp.lt.s32.totalorder %s59_s20, %s59_s20 }
  0x35   :  { %p2029_p8 = scmp.ne.s32.totalorder %s59_s20, %s2028_s29  ;;  %p2034_p10 = scmp.lt.s32.totalorder %s2028_s29, %s2028_s29 }
  0x37   :  { %p2035_p11 = por %p2034_p10, %p2033_p9 }
  0x39   :  { %p2036_p12 = pnand %p2035_p11, %p2029_p8 }
  0x3b   :  { %2039 = shalt.err (!%p2036_p12)
}
  0x3c   :  { %64 = dma.hbm_to_vmem [thread:$0]  %s2565_s4, 512, %s59_s20, [#allocation10], %s2121_s0, %s2121_s0, %s2122_s16  }
  0x3d   :  { %2106 = dma.done.wait [#allocation7], 32  }
  0x3e   :  { %2107 = vsyncadd [#allocation7], 4294967264 }
  0x3f   :  { %2108 = dma.done.wait [#allocation5], 512  }
  0x40   :  { %2109 = vsyncadd [#allocation5], 4294966784 }
  0x41   :  { %2110 = dma.done.wait [#allocation10], 2560  }
  0x42   :  { %2111 = vsyncadd [#allocation10], 4294964736 }
  0x43   :  { %79 = sfence }
  0x44   :  { %s80_s28 = sld [smem:[#allocation4]]  ;;  %s2124_s4 = smov 64   ;;  %v152_v14 = vld [vmem:[#allocation9 + $0x8] sm:$0xff]  ;;  %v154_v15 = vld [vmem:[#allocation9 + $0x18] sm:$0xff]  ;;  %v151_v16 = vld [vmem:[#allocation9] sm:$0xff]  ;;  %v2126_v39 = vmov 0.0  }
  0x45   :  { %s1619_s30 = sld [smem:[#allocation4 + $0x80]]  ;;  %s2125_s11 = smov 32   ;;  %v2243_v17 = vpack.c.bf16 %v154_v15, %v152_v14  ;;  %v153_v18 = vld [vmem:[#allocation9 + $0x10] sm:$0xff]  ;;  %v156_v19 = vld [vmem:[#allocation9 + $0x28] sm:$0xff]  ;;  %v158_v20 = vld [vmem:[#allocation9 + $0x38] sm:$0xff]  ;;  %274 = vmatprep.mubr.f32.mxu0 %v2126_v39  ;;  %415 = vmatprep.mubr.f32.mxu1 %v2126_v39  ;;  %vm204_vm0 = vcmask 261120  }
  0x46   :  { %v2245_v21 = vpack.c.bf16 %v153_v18, %v151_v16  ;;  %v2247_v22 = vpack.c.bf16 %v158_v20, %v156_v19  ;;  %v155_v23 = vld [vmem:[#allocation9 + $0x20] sm:$0xff]  ;;  %v157_v24 = vld [vmem:[#allocation9 + $0x30] sm:$0xff]  ;;  %v160_v25 = vld [vmem:[#allocation9 + $0x48] sm:$0xff]  ;;  %s1620_s12 = sld [smem:[#allocation4 + $0x1]]  ;;  %vm206_vm1 = vcmask 523264   ;;  %s1623_s19 = sld [smem:[#allocation4 + $0x82]] }
  0x47   :  { %1711 = vmatprep.subr.bf16.mxu0 %v2243_v17  ;;  %v162_v26 = vld [vmem:[#allocation9 + $0x58] sm:$0xff]  ;;  %1727 = vmatprep.subr.bf16.mxu1 %v2243_v17  ;;  %v2252_v27 = vpack.c.bf16 %v157_v24, %v155_v23  ;;  %v159_v29 = vld [vmem:[#allocation9 + $0x40] sm:$0xff]  ;;  %v161_v30 = vld [vmem:[#allocation9 + $0x50] sm:$0xff]  ;;  %s1621_s13 = sld [smem:[#allocation4 + $0x81]]  ;;  %s1624_s22 = sld [smem:[#allocation4 + $0x3]]  ;;  %vm338_vm2 = vcmask 254976  }
  0x48   :  { %1713 = vmatpush1.bf16.msra.mxu0 %v2245_v21  ;;  %1729 = vmatpush1.bf16.msra.mxu1 %v2245_v21  ;;  %v2256_v28 = vpack.c.bf16 %v162_v26, %v160_v25  ;;  %v164_v31 = vld [vmem:[#allocation9 + $0x68] sm:$0xff]  ;;  %v166_v32 = vld [vmem:[#allocation9 + $0x78] sm:$0xff]  ;;  %v2260_v33 = vpack.c.bf16 %v161_v30, %v159_v29  ;;  %v163_v35 = vld [vmem:[#allocation9 + $0x60] sm:$0xff]  ;;  %s1625_s23 = sld [smem:[#allocation4 + $0x83]]  ;;  %s1626_s26 = sld [smem:[#allocation4 + $0x4]]  ;;  %vm2129_vm3 = vmmov 0  }
  0x49   :  { %1715 = vmatprep.subr.bf16.mxu0 %v2247_v22  ;;  %1731 = vmatprep.subr.bf16.mxu1 %v2247_v22  ;;  %v2264_v34 = vpack.c.bf16 %v166_v32, %v164_v31  ;;  %v165_v36 = vld [vmem:[#allocation9 + $0x70] sm:$0xff]  ;;  %v2296_v47 = vld [vmem:[%s2564_s3] ss:$0 sm:$0xff]  ;;  %s1622_s3 = sld [smem:[#allocation4 + $0x2]]  ;;  %s1627_s27 = sld [smem:[#allocation4 + $0x84]]  ;;  %vm1347_vm4 = vcmask 1040384  }
  0x4a   :  { %s81_s9 = scalar_lea.vmem [#allocation8], %s80_s28  ;;  %v2269_v38 = vpack.c.bf16 %v165_v36, %v163_v35  ;;  %s1628_s2 = sld [smem:[#allocation4 + $0x5]]  ;;  %vm1349_vm5 = vcmask 1041408   ;;  %vm1351_vm6 = vcmask 1042432   ;;  %vm1353_vm7 = vcmask 1043456  }
  0x4b   :  { %v82_v0 = vld [vmem:[%s81_s9] sm:$0x1]  ;;  %s85_s10 = scalar_lea.vmem [#allocation8], %s1619_s30  ;;  %s1629_s28 = sld [smem:[#allocation4 + $0x85]]  ;;  %vm1355_vm8 = vcmask 1044480   ;;  %vm1357_vm9 = vcmask 1045504  }
  0x4c   :  { %v86_v1 = vld [vmem:[%s85_s10] sm:$0x1]  ;;  %83 = vst [vmem:[#allocation2] sm:$0x1] %v82_v0  ;;  %1717 = vmatpush1.bf16.msra.mxu0 %v2252_v27  ;;  %1733 = vmatpush1.bf16.msra.mxu1 %v2252_v27  ;;  %s89_s14 = scalar_lea.vmem [#allocation8], %s1620_s12  ;;  %s103_s21 = scalar_lea.vmem [#allocation8], %s1623_s19 }
  0x4d   :  { %87 = vst [vmem:[#allocation2 + $0x1] sm:$0x1] %v86_v1  ;;  %1719 = vmatprep.subr.bf16.mxu0 %v2256_v28  ;;  %1735 = vmatprep.subr.bf16.mxu1 %v2256_v28  ;;  %v90_v40 = vld [vmem:[%s89_s14] sm:$0x1]  ;;  %s94_s15 = scalar_lea.vmem [#allocation8], %s1621_s13  ;;  %s107_s24 = scalar_lea.vmem [#allocation8], %s1624_s22 }
  0x4e   :  { %v95_v41 = vld [vmem:[%s94_s15] sm:$0x1]  ;;  %92 = vst [vmem:[#allocation2 + $0x2] sm:$0x1] %v90_v40  ;;  %s112_s25 = scalar_lea.vmem [#allocation8], %s1625_s23  ;;  %s116_s29 = scalar_lea.vmem [#allocation8], %s1626_s26 }
  0x4f   :  { %96 = vst [vmem:[#allocation2 + $0x3] sm:$0x1] %v95_v41  ;;  %s98_s20 = scalar_lea.vmem [#allocation8], %s1622_s3  ;;  %s121_s1 = scalar_lea.vmem [#allocation8], %s1627_s27  ;;  %vm1359_vm10 = vcmask 1046528  }
  0x50   :  { %1721 = vmatpush1.bf16.msra.mxu0 %v2260_v33  ;;  %1737 = vmatpush1.bf16.msra.mxu1 %v2260_v33  ;;  %s125_s30 = scalar_lea.vmem [#allocation8], %s1628_s2  ;;  %s1630_s10 = sld [smem:[#allocation4 + $0x6]] }
  0x51   :  { %1723 = vmatprep.subr.bf16.mxu0 %v2264_v34  ;;  %1739 = vmatprep.subr.bf16.mxu1 %v2264_v34  ;;  %s130_s9 = scalar_lea.vmem [#allocation8], %s1629_s28  ;;  %s1631_s12 = sld [smem:[#allocation4 + $0x86]] }
  0x52   :  { %s1632_s15 = sld [smem:[#allocation4 + $0x7]]  ;;  %s2127_s19 = smov 96  }
  0x53   :  { %s1633_s17 = sld [smem:[#allocation4 + $0x87]] }
  0x54   :  { %v174_v2 = vld [vmem:[#allocation2] sm:$0x3]  ;;  %1725 = vmatpush1.bf16.msra.mxu0 %v2269_v38  ;;  %1741 = vmatpush1.bf16.msra.mxu1 %v2269_v38 }
  0x55   :  { %v1635_v3 = vmul.f32 -1.442695, %v174_v2  ;;  %1743 = vmatprep.subr.bf16.mxu0 %v2243_v17  ;;  %1759 = vmatprep.subr.bf16.mxu1 %v2243_v17 }
  0x56   :  { %v281_v46 = vld [vmem:[#allocation2 + $0x2] sm:$0x3]  ;;  %s134_s13 = scalar_lea.vmem [#allocation8], %s1630_s10 }
  0x57   :  { %1868 = vpow2.f32 %v1635_v3  ;;  %s139_s14 = scalar_lea.vmem [#allocation8], %s1631_s12 }
  0x58   :  { %s143_s18 = scalar_lea.vmem [#allocation8], %s1632_s15 }
  0x59   :  { %s148_s3 = scalar_lea.vmem [#allocation8], %s1633_s17 }
  0x61   :  { %v1869_v4 = vpop.eup %1868 }
  0x62   :  { %v178_v5 = vadd.f32 1.0, %v1869_v4 }
  0x64   :  { %1870 = vrcp.f32 %v178_v5 }
  0x6e   :  { %v2233_v6 = vpop.eup %1870 }
  0x6f   :  { %v181_v7 = vmul.f32 2.0, %v2233_v6  ;;  %v183_v11 = vmul.f32 0.0, %v2233_v6 }
  0x71   :  { %v1636_v8 = vadd.f32 -1.0, %v181_v7 }
  0x73   :  { %185 = vrot.lane.b32.xlu0 %v1636_v8, %s2124_s4 }
  0xe5   :  { %v186_v9 = vpop.permute.xlu0 %185 }
  0xe6   :  { %v188_v10 = vmul.f32 %v2233_v6, %v186_v9 }
  0xe8   :  { %190 = vrot.lane.b32.xlu0 %v188_v10, %s2125_s11 }
 0x15a   :  { %v191_v12 = vpop.permute.xlu0 %190 }
 0x15b   :  { %v2240_v13 = vadd.f32 %v191_v12, %v183_v11  ;;  %v99_v12 = vld [vmem:[%s98_s20] sm:$0x1] }
 0x15c   :  { %101 = vst [vmem:[#allocation2 + $0x4] sm:$0x1] %v99_v12 }
 0x15d   :  { %1872 = vtanh.f32 %v2240_v13 }
 0x167   :  { %v1873_v37 = vpop.eup %1872 }
 0x168   :  { %196 = vrot.lane.b32.xlu1 %v1873_v37, %s2124_s4 }
 0x1da   :  { %v197_v42 = vpop.permute.xlu1 %196 }
 0x1db   :  { %v199_v43 = vmul.f32 %v2233_v6, %v197_v42 }
 0x1dd   :  { %201 = vrot.lane.b32.xlu1 %v199_v43, %s2125_s11 }
 0x24f   :  { %v202_v44 = vpop.permute.xlu1 %201 }
 0x250   :  { %v205_v45 = vsel %vm204_vm0, %v202_v44, 0.0 }
 0x251   :  { %1637 = vmatmul.mubr.msk.f32.vlgmr.msra.gmra.mrb[0].mxu0 %vm206_vm1, %v205_v45 }
 0x252   :  { %1745 = vmatpush1.bf16.msra.mxu0 %v2245_v21  ;;  %556 = vmatprep.mubr.f32.mxu0 %v2126_v39 }
 0x253   :  { %1747 = vmatprep.subr.bf16.mxu0 %v2247_v22 }
 0x256   :  { %1749 = vmatpush1.bf16.msra.mxu0 %v2252_v27 }
 0x257   :  { %1751 = vmatprep.subr.bf16.mxu0 %v2256_v28 }
 0x25a   :  { %1753 = vmatpush1.bf16.msra.mxu0 %v2260_v33 }
 0x25b   :  { %1755 = vmatprep.subr.bf16.mxu0 %v2264_v34 }
 0x25e   :  { %1757 = vmatpush1.bf16.msra.mxu0 %v2269_v38 }
 0x25f   :  { %1775 = vmatprep.subr.bf16.mxu0 %v2243_v17 }
 0x324   :  { %v276_v48 = vpop.f32.mrb[0].mxu0 }
 0x325   :  { %v282_v49 = vadd.f32 %v281_v46, %v276_v48  ;;  %v278_v50 = vpop.f32.mrb[1].mxu0 }
 0x326   :  { %v283_v51 = vadd.f32 %v2296_v47, %v278_v50 }
 0x327   :  { %v1638_v52 = vmul.f32 -1.442695, %v282_v49 }
 0x328   :  { %v1640_v53 = vmul.f32 -1.442695, %v283_v51 }
 0x329   :  { %1874 = vpow2.f32 %v1638_v52 }
 0x32a   :  { %1876 = vpow2.f32 %v1640_v53 }
 0x333   :  { %v1875_v54 = vpop.eup %1874 }
 0x334   :  { %v1877_v55 = vpop.eup %1876  ;;  %v287_v56 = vadd.f32 1.0, %v1875_v54 }
 0x335   :  { %v312_v57 = vadd.f32 1.0, %v1877_v55 }
 0x336   :  { %1878 = vrcp.f32 %v287_v56 }
 0x337   :  { %1880 = vrcp.f32 %v312_v57 }
 0x340   :  { %v1879_v58 = vpop.eup %1878 }
 0x341   :  { %v1881_v59 = vpop.eup %1880  ;;  %v290_v60 = vmul.f32 2.0, %v1879_v58  ;;  %v292_v4 = vmul.f32 %v1879_v58, %v2240_v13  ;;  %v104_v13 = vld [vmem:[%s103_s21] sm:$0x1] }
 0x342   :  { %v315_v61 = vmul.f32 2.0, %v1881_v59  ;;  %v317_v6 = vmul.f32 0.0, %v1881_v59  ;;  %105 = vst [vmem:[#allocation2 + $0x5] sm:$0x1] %v104_v13 }
 0x343   :  { %v1639_v62 = vadd.f32 -1.0, %v290_v60  ;;  %v108_v60 = vld [vmem:[%s107_s24] sm:$0x1] }
 0x344   :  { %v1641_v63 = vadd.f32 -1.0, %v315_v61  ;;  %v113_v61 = vld [vmem:[%s112_s25] sm:$0x1]  ;;  %110 = vst [vmem:[#allocation2 + $0x6] sm:$0x1] %v108_v60 }
 0x345   :  { %294 = vrot.lane.b32.xlu0 %v1639_v62, %s2124_s4  ;;  %114 = vst [vmem:[#allocation2 + $0x7] sm:$0x1] %v113_v61 }
 0x346   :  { %319 = vrot.lane.b32.xlu1 %v1641_v63, %s2124_s4 }
 0x349   :  { %v422_v24 = vld [vmem:[#allocation2 + $0x4] sm:$0x3] }
 0x3b7   :  { %v295_v0 = vpop.permute.xlu0 %294 }
 0x3b8   :  { %v297_v1 = vmul.f32 %v1879_v58, %v295_v0  ;;  %v320_v2 = vpop.permute.xlu1 %319 }
 0x3b9   :  { %v322_v3 = vmul.f32 %v1881_v59, %v320_v2 }
 0x3ba   :  { %299 = vrot.lane.b32.xlu0 %v297_v1, %s2125_s11 }
 0x3bb   :  { %324 = vrot.lane.b32.xlu1 %v322_v3, %s2125_s11 }
 0x42c   :  { %v300_v5 = vpop.permute.xlu0 %299 }
 0x42d   :  { %v2304_v7 = vadd.f32 %v300_v5, %v292_v4  ;;  %v325_v8 = vpop.permute.xlu1 %324  ;;  %v563_v5 = vld [vmem:[#allocation2 + $0x6] sm:$0x3] }
 0x42e   :  { %v2306_v9 = vadd.f32 %v325_v8, %v317_v6 }
 0x42f   :  { %1882 = vtanh.f32 %v2304_v7 }
 0x430   :  { %1884 = vtanh.f32 %v2306_v9 }
 0x439   :  { %v1883_v10 = vpop.eup %1882 }
 0x43a   :  { %v1885_v11 = vpop.eup %1884  ;;  %305 = vrot.lane.b32.xlu0 %v1883_v10, %s2124_s4 }
 0x43b   :  { %330 = vrot.lane.b32.xlu1 %v1885_v11, %s2124_s4 }
 0x4ac   :  { %v306_v14 = vpop.permute.xlu0 %305 }
 0x4ad   :  { %v308_v15 = vmul.f32 %v1879_v58, %v306_v14  ;;  %v331_v16 = vpop.permute.xlu1 %330 }
 0x4ae   :  { %v2312_v18 = vmul.f32 %v1881_v59, %v331_v16 }
 0x4af   :  { %341 = vrot.lane.b32.xlu0 %v308_v15, %s2125_s11 }
 0x4b0   :  { %344 = vrot.lane.b32.xlu1 %v2312_v18, %s2124_s4 }
 0x521   :  { %v342_v19 = vpop.permute.xlu0 %341 }
 0x522   :  { %v345_v20 = vpop.permute.xlu1 %344 }
 0x523   :  { %v347_v23 = vsel %vm204_vm0, %v342_v19, %v345_v20 }
 0x524   :  { %1642 = vmatmul.mubr.msk.f32.vlgmr.msra.gmra.mrb[0].mxu1 %vm206_vm1, %v347_v23 }
 0x525   :  { %1761 = vmatpush1.bf16.msra.mxu1 %v2245_v21  ;;  %697 = vmatprep.mubr.f32.mxu1 %v2126_v39 }
 0x526   :  { %1763 = vmatprep.subr.bf16.mxu1 %v2247_v22 }
 0x529   :  { %1765 = vmatpush1.bf16.msra.mxu1 %v2252_v27 }
 0x52a   :  { %1767 = vmatprep.subr.bf16.mxu1 %v2256_v28 }
 0x52d   :  { %1769 = vmatpush1.bf16.msra.mxu1 %v2260_v33 }
 0x52e   :  { %1771 = vmatprep.subr.bf16.mxu1 %v2264_v34 }
 0x531   :  { %1773 = vmatpush1.bf16.msra.mxu1 %v2269_v38 }
 0x532   :  { %1791 = vmatprep.subr.bf16.mxu1 %v2243_v17 }
 0x5f7   :  { %v417_v25 = vpop.f32.mrb[0].mxu1 }
 0x5f8   :  { %v423_v26 = vadd.f32 %v422_v24, %v417_v25  ;;  %v419_v29 = vpop.f32.mrb[1].mxu1 }
 0x5f9   :  { %v424_v30 = vadd.f32 %v2296_v47, %v419_v29 }
 0x5fa   :  { %v1643_v31 = vmul.f32 -1.442695, %v423_v26 }
 0x5fb   :  { %v1645_v32 = vmul.f32 -1.442695, %v424_v30 }
 0x5fc   :  { %1886 = vpow2.f32 %v1643_v31 }
 0x5fd   :  { %1888 = vpow2.f32 %v1645_v32 }
 0x606   :  { %v1887_v35 = vpop.eup %1886 }
 0x607   :  { %v1889_v36 = vpop.eup %1888  ;;  %v428_v37 = vadd.f32 1.0, %v1887_v35 }
 0x608   :  { %v453_v40 = vadd.f32 1.0, %v1889_v36 }
 0x609   :  { %1890 = vrcp.f32 %v428_v37 }
 0x60a   :  { %1892 = vrcp.f32 %v453_v40 }
 0x613   :  { %v1891_v41 = vpop.eup %1890 }
 0x614   :  { %v1893_v42 = vpop.eup %1892  ;;  %v431_v43 = vmul.f32 2.0, %v1891_v41  ;;  %v433_v52 = vmul.f32 %v1891_v41, %v2304_v7 }
 0x615   :  { %v456_v44 = vmul.f32 2.0, %v1893_v42  ;;  %v458_v54 = vmul.f32 %v1893_v42, %v2306_v9 }
 0x616   :  { %v1644_v45 = vadd.f32 -1.0, %v431_v43 }
 0x617   :  { %v1646_v46 = vadd.f32 -1.0, %v456_v44  ;;  %v117_v44 = vld [vmem:[%s116_s29] sm:$0x1] }
 0x618   :  { %435 = vrot.lane.b32.xlu0 %v1644_v45, %s2124_s4  ;;  %v122_v45 = vld [vmem:[%s121_s1] sm:$0x1]  ;;  %119 = vst [vmem:[#allocation2 + $0x8] sm:$0x1] %v117_v44 }
 0x619   :  { %460 = vrot.lane.b32.xlu1 %v1646_v46, %s2124_s4  ;;  %123 = vst [vmem:[#allocation2 + $0x9] sm:$0x1] %v122_v45 }
 0x68a   :  { %v436_v48 = vpop.permute.xlu0 %435 }
 0x68b   :  { %v438_v49 = vmul.f32 %v1891_v41, %v436_v48  ;;  %v461_v50 = vpop.permute.xlu1 %460 }
 0x68c   :  { %v463_v51 = vmul.f32 %v1893_v42, %v461_v50 }
 0x68d   :  { %440 = vrot.lane.b32.xlu0 %v438_v49, %s2125_s11 }
 0x68e   :  { %465 = vrot.lane.b32.xlu1 %v463_v51, %s2125_s11 }
 0x6ff   :  { %v441_v53 = vpop.permute.xlu0 %440 }
 0x700   :  { %v2335_v55 = vadd.f32 %v441_v53, %v433_v52  ;;  %v466_v56 = vpop.permute.xlu1 %465 }
 0x701   :  { %v2337_v57 = vadd.f32 %v466_v56, %v458_v54  ;;  %v704_v54 = vld [vmem:[#allocation2 + $0x8] sm:$0x3] }
 0x702   :  { %1894 = vtanh.f32 %v2335_v55 }
 0x703   :  { %1896 = vtanh.f32 %v2337_v57 }
 0x70c   :  { %v1895_v58 = vpop.eup %1894 }
 0x70d   :  { %v1897_v59 = vpop.eup %1896  ;;  %446 = vrot.lane.b32.xlu0 %v1895_v58, %s2124_s4 }
 0x70e   :  { %471 = vrot.lane.b32.xlu1 %v1897_v59, %s2124_s4 }
 0x77f   :  { %v447_v62 = vpop.permute.xlu0 %446 }
 0x780   :  { %v449_v63 = vmul.f32 %v1891_v41, %v447_v62  ;;  %v472_v0 = vpop.permute.xlu1 %471 }
 0x781   :  { %v2343_v1 = vmul.f32 %v1893_v42, %v472_v0 }
 0x782   :  { %482 = vrot.lane.b32.xlu0 %v449_v63, %s2125_s11 }
 0x783   :  { %485 = vrot.lane.b32.xlu1 %v2343_v1, %s2124_s4 }
 0x7f4   :  { %v483_v2 = vpop.permute.xlu0 %482 }
 0x7f5   :  { %v486_v3 = vpop.permute.xlu1 %485 }
 0x7f6   :  { %v488_v4 = vsel %vm204_vm0, %v483_v2, %v486_v3 }
 0x7f7   :  { %1647 = vmatmul.mubr.msk.f32.vlgmr.msra.gmra.mrb[2].mxu0 %vm206_vm1, %v488_v4 }
 0x7f8   :  { %1777 = vmatpush1.bf16.msra.mxu0 %v2245_v21  ;;  %838 = vmatprep.mubr.f32.mxu0 %v2126_v39 }
 0x7f9   :  { %1779 = vmatprep.subr.bf16.mxu0 %v2247_v22 }
 0x7fc   :  { %1781 = vmatpush1.bf16.msra.mxu0 %v2252_v27 }
 0x7fd   :  { %1783 = vmatprep.subr.bf16.mxu0 %v2256_v28 }
 0x800   :  { %1785 = vmatpush1.bf16.msra.mxu0 %v2260_v33 }
 0x801   :  { %1787 = vmatprep.subr.bf16.mxu0 %v2264_v34 }
 0x804   :  { %1789 = vmatpush1.bf16.msra.mxu0 %v2269_v38 }
 0x805   :  { %1807 = vmatprep.subr.bf16.mxu0 %v2243_v17 }
 0x8ca   :  { %v558_v6 = vpop.f32.mrb[2].mxu0 }
 0x8cb   :  { %v564_v7 = vadd.f32 %v563_v5, %v558_v6  ;;  %v560_v8 = vpop.f32.mrb[3].mxu0 }
 0x8cc   :  { %v565_v9 = vadd.f32 %v2296_v47, %v560_v8 }
 0x8cd   :  { %v1648_v10 = vmul.f32 -1.442695, %v564_v7 }
 0x8ce   :  { %v1650_v11 = vmul.f32 -1.442695, %v565_v9 }
 0x8cf   :  { %1898 = vpow2.f32 %v1648_v10 }
 0x8d0   :  { %1900 = vpow2.f32 %v1650_v11 }
 0x8d9   :  { %v1899_v12 = vpop.eup %1898 }
 0x8da   :  { %v1901_v13 = vpop.eup %1900  ;;  %v569_v14 = vadd.f32 1.0, %v1899_v12 }
 0x8db   :  { %v594_v15 = vadd.f32 1.0, %v1901_v13 }
 0x8dc   :  { %1902 = vrcp.f32 %v569_v14 }
 0x8dd   :  { %1904 = vrcp.f32 %v594_v15 }
 0x8e6   :  { %v1903_v16 = vpop.eup %1902 }
 0x8e7   :  { %v1905_v19 = vpop.eup %1904  ;;  %v572_v20 = vmul.f32 2.0, %v1903_v16  ;;  %v574_v32 = vmul.f32 %v1903_v16, %v2335_v55 }
 0x8e8   :  { %v597_v23 = vmul.f32 2.0, %v1905_v19  ;;  %v599_v36 = vmul.f32 %v1905_v19, %v2337_v57 }
 0x8e9   :  { %v1649_v24 = vadd.f32 -1.0, %v572_v20 }
 0x8ea   :  { %v1651_v25 = vadd.f32 -1.0, %v597_v23  ;;  %v126_v23 = vld [vmem:[%s125_s30] sm:$0x1] }
 0x8eb   :  { %576 = vrot.lane.b32.xlu0 %v1649_v24, %s2124_s4  ;;  %v131_v24 = vld [vmem:[%s130_s9] sm:$0x1]  ;;  %128 = vst [vmem:[#allocation2 + $0xa] sm:$0x1] %v126_v23 }
 0x8ec   :  { %601 = vrot.lane.b32.xlu1 %v1651_v25, %s2124_s4  ;;  %132 = vst [vmem:[#allocation2 + $0xb] sm:$0x1] %v131_v24 }
 0x95d   :  { %v577_v26 = vpop.permute.xlu0 %576 }
 0x95e   :  { %v579_v29 = vmul.f32 %v1903_v16, %v577_v26  ;;  %v602_v30 = vpop.permute.xlu1 %601 }
 0x95f   :  { %v604_v31 = vmul.f32 %v1905_v19, %v602_v30 }
 0x960   :  { %581 = vrot.lane.b32.xlu0 %v579_v29, %s2125_s11 }
 0x961   :  { %606 = vrot.lane.b32.xlu1 %v604_v31, %s2125_s11 }
 0x9d2   :  { %v582_v35 = vpop.permute.xlu0 %581 }
 0x9d3   :  { %v2366_v37 = vadd.f32 %v582_v35, %v574_v32  ;;  %v607_v40 = vpop.permute.xlu1 %606 }
 0x9d4   :  { %v2368_v41 = vadd.f32 %v607_v40, %v599_v36  ;;  %v845_v36 = vld [vmem:[#allocation2 + $0xa] sm:$0x3] }
 0x9d5   :  { %1906 = vtanh.f32 %v2366_v37 }
 0x9d6   :  { %1908 = vtanh.f32 %v2368_v41 }
 0x9df   :  { %v1907_v42 = vpop.eup %1906 }
 0x9e0   :  { %v1909_v43 = vpop.eup %1908  ;;  %587 = vrot.lane.b32.xlu0 %v1907_v42, %s2124_s4 }
 0x9e1   :  { %612 = vrot.lane.b32.xlu1 %v1909_v43, %s2124_s4 }
 0xa52   :  { %v588_v46 = vpop.permute.xlu0 %587 }
 0xa53   :  { %v590_v48 = vmul.f32 %v1903_v16, %v588_v46  ;;  %v613_v49 = vpop.permute.xlu1 %612 }
 0xa54   :  { %v2374_v50 = vmul.f32 %v1905_v19, %v613_v49 }
 0xa55   :  { %623 = vrot.lane.b32.xlu0 %v590_v48, %s2125_s11 }
 0xa56   :  { %626 = vrot.lane.b32.xlu1 %v2374_v50, %s2124_s4 }
 0xac7   :  { %v624_v51 = vpop.permute.xlu0 %623 }
 0xac8   :  { %v627_v52 = vpop.permute.xlu1 %626 }
 0xac9   :  { %v629_v53 = vsel %vm204_vm0, %v624_v51, %v627_v52 }
 0xaca   :  { %1652 = vmatmul.mubr.msk.f32.vlgmr.msra.gmra.mrb[2].mxu1 %vm206_vm1, %v629_v53 }
 0xacb   :  { %1793 = vmatpush1.bf16.msra.mxu1 %v2245_v21  ;;  %979 = vmatprep.mubr.f32.mxu1 %v2126_v39 }
 0xacc   :  { %1795 = vmatprep.subr.bf16.mxu1 %v2247_v22 }
 0xacf   :  { %1797 = vmatpush1.bf16.msra.mxu1 %v2252_v27 }
 0xad0   :  { %1799 = vmatprep.subr.bf16.mxu1 %v2256_v28 }
 0xad3   :  { %1801 = vmatpush1.bf16.msra.mxu1 %v2260_v33 }
 0xad4   :  { %1803 = vmatprep.subr.bf16.mxu1 %v2264_v34 }
 0xad7   :  { %1805 = vmatpush1.bf16.msra.mxu1 %v2269_v38 }
 0xad8   :  { %1823 = vmatprep.subr.bf16.mxu1 %v2243_v17 }
 0xb9d   :  { %v699_v55 = vpop.f32.mrb[2].mxu1 }
 0xb9e   :  { %v705_v56 = vadd.f32 %v704_v54, %v699_v55  ;;  %v701_v57 = vpop.f32.mrb[3].mxu1 }
 0xb9f   :  { %v706_v58 = vadd.f32 %v2296_v47, %v701_v57 }
 0xba0   :  { %v1653_v59 = vmul.f32 -1.442695, %v705_v56 }
 0xba1   :  { %v1655_v60 = vmul.f32 -1.442695, %v706_v58 }
 0xba2   :  { %1910 = vpow2.f32 %v1653_v59 }
 0xba3   :  { %1912 = vpow2.f32 %v1655_v60 }
 0xbac   :  { %v1911_v61 = vpop.eup %1910 }
 0xbad   :  { %v1913_v62 = vpop.eup %1912  ;;  %v710_v63 = vadd.f32 1.0, %v1911_v61 }
 0xbae   :  { %v735_v0 = vadd.f32 1.0, %v1913_v62 }
 0xbaf   :  { %1914 = vrcp.f32 %v710_v63 }
 0xbb0   :  { %1916 = vrcp.f32 %v735_v0 }
 0xbb9   :  { %v1915_v2 = vpop.eup %1914 }
 0xbba   :  { %v1917_v3 = vpop.eup %1916  ;;  %v713_v4 = vmul.f32 2.0, %v1915_v2  ;;  %v715_v11 = vmul.f32 %v1915_v2, %v2366_v37 }
 0xbbb   :  { %v738_v17 = vmul.f32 2.0, %v1917_v3  ;;  %v740_v13 = vmul.f32 %v1917_v3, %v2368_v41 }
 0xbbc   :  { %v1654_v5 = vadd.f32 -1.0, %v713_v4 }
 0xbbd   :  { %v1656_v6 = vadd.f32 -1.0, %v738_v17 }
 0xbbe   :  { %717 = vrot.lane.b32.xlu0 %v1654_v5, %s2124_s4  ;;  %v135_v5 = vld [vmem:[%s134_s13] sm:$0x1] }
 0xbbf   :  { %742 = vrot.lane.b32.xlu1 %v1656_v6, %s2124_s4  ;;  %v140_v6 = vld [vmem:[%s139_s14] sm:$0x1]  ;;  %137 = vst [vmem:[#allocation2 + $0xc] sm:$0x1] %v135_v5 }
 0xbc0   :  { %141 = vst [vmem:[#allocation2 + $0xd] sm:$0x1] %v140_v6 }
 0xc30   :  { %v718_v7 = vpop.permute.xlu0 %717 }
 0xc31   :  { %v720_v8 = vmul.f32 %v1915_v2, %v718_v7  ;;  %v743_v9 = vpop.permute.xlu1 %742 }
 0xc32   :  { %v745_v10 = vmul.f32 %v1917_v3, %v743_v9 }
 0xc33   :  { %722 = vrot.lane.b32.xlu0 %v720_v8, %s2125_s11 }
 0xc34   :  { %747 = vrot.lane.b32.xlu1 %v745_v10, %s2125_s11 }
 0xca5   :  { %v723_v12 = vpop.permute.xlu0 %722 }
 0xca6   :  { %v2397_v14 = vadd.f32 %v723_v12, %v715_v11  ;;  %v748_v15 = vpop.permute.xlu1 %747 }
 0xca7   :  { %v2399_v16 = vadd.f32 %v748_v15, %v740_v13 }
 0xca8   :  { %1918 = vtanh.f32 %v2397_v14 }
 0xca9   :  { %1920 = vtanh.f32 %v2399_v16 }
 0xcb2   :  { %v1919_v19 = vpop.eup %1918 }
 0xcb3   :  { %v1921_v20 = vpop.eup %1920  ;;  %728 = vrot.lane.b32.xlu0 %v1919_v19, %s2124_s4 }
 0xcb4   :  { %753 = vrot.lane.b32.xlu1 %v1921_v20, %s2124_s4 }
 0xd25   :  { %v729_v25 = vpop.permute.xlu0 %728 }
 0xd26   :  { %v731_v26 = vmul.f32 %v1915_v2, %v729_v25  ;;  %v754_v29 = vpop.permute.xlu1 %753 }
 0xd27   :  { %v2405_v30 = vmul.f32 %v1917_v3, %v754_v29 }
 0xd28   :  { %764 = vrot.lane.b32.xlu0 %v731_v26, %s2125_s11 }
 0xd29   :  { %767 = vrot.lane.b32.xlu1 %v2405_v30, %s2124_s4 }
 0xd9a   :  { %v765_v31 = vpop.permute.xlu0 %764 }
 0xd9b   :  { %v768_v32 = vpop.permute.xlu1 %767 }
 0xd9c   :  { %v770_v35 = vsel %vm204_vm0, %v765_v31, %v768_v32 }
 0xd9d   :  { %1657 = vmatmul.mubr.msk.f32.vlgmr.msra.gmra.mrb[4].mxu0 %vm206_vm1, %v770_v35 }
 0xd9e   :  { %1809 = vmatpush1.bf16.msra.mxu0 %v2245_v21  ;;  %1120 = vmatprep.mubr.f32.mxu0 %v2126_v39 }
 0xd9f   :  { %1811 = vmatprep.subr.bf16.mxu0 %v2247_v22 }
 0xda2   :  { %1813 = vmatpush1.bf16.msra.mxu0 %v2252_v27 }
 0xda3   :  { %1815 = vmatprep.subr.bf16.mxu0 %v2256_v28 }
 0xda6   :  { %1817 = vmatpush1.bf16.msra.mxu0 %v2260_v33 }
 0xda7   :  { %1819 = vmatprep.subr.bf16.mxu0 %v2264_v34 }
 0xdaa   :  { %1821 = vmatpush1.bf16.msra.mxu0 %v2269_v38 }
 0xe70   :  { %v840_v37 = vpop.f32.mrb[4].mxu0 }
 0xe71   :  { %v846_v40 = vadd.f32 %v845_v36, %v840_v37  ;;  %v842_v41 = vpop.f32.mrb[5].mxu0 }
 0xe72   :  { %v847_v42 = vadd.f32 %v2296_v47, %v842_v41 }
 0xe73   :  { %v1658_v43 = vmul.f32 -1.442695, %v846_v40 }
 0xe74   :  { %v1660_v44 = vmul.f32 -1.442695, %v847_v42 }
 0xe75   :  { %1922 = vpow2.f32 %v1658_v43 }
 0xe76   :  { %1924 = vpow2.f32 %v1660_v44 }
 0xe7f   :  { %v1923_v45 = vpop.eup %1922 }
 0xe80   :  { %v1925_v46 = vpop.eup %1924  ;;  %v851_v48 = vadd.f32 1.0, %v1923_v45 }
 0xe81   :  { %v876_v49 = vadd.f32 1.0, %v1925_v46 }
 0xe82   :  { %1926 = vrcp.f32 %v851_v48  ;;  %v144_v48 = vld [vmem:[%s143_s18] sm:$0x1] }
 0xe83   :  { %1928 = vrcp.f32 %v876_v49  ;;  %v149_v49 = vld [vmem:[%s148_s3] sm:$0x1]  ;;  %146 = vst [vmem:[#allocation2 + $0xe] sm:$0x1] %v144_v48 }
 0xe84   :  { %150 = vst [vmem:[#allocation2 + $0xf] sm:$0x1] %v149_v49 }
 0xe8c   :  { %v1927_v51 = vpop.eup %1926 }
 0xe8d   :  { %v1929_v52 = vpop.eup %1928  ;;  %v854_v53 = vmul.f32 2.0, %v1927_v51  ;;  %v856_v61 = vmul.f32 %v1927_v51, %v2397_v14  ;;  %v986_v14 = vld [vmem:[#allocation2 + $0xc] sm:$0x3] }
 0xe8e   :  { %v879_v54 = vmul.f32 2.0, %v1929_v52  ;;  %v881_v63 = vmul.f32 %v1929_v52, %v2399_v16 }
 0xe8f   :  { %v1659_v55 = vadd.f32 -1.0, %v854_v53 }
 0xe90   :  { %v1661_v56 = vadd.f32 -1.0, %v879_v54 }
 0xe91   :  { %858 = vrot.lane.b32.xlu0 %v1659_v55, %s2124_s4 }
 0xe92   :  { %883 = vrot.lane.b32.xlu1 %v1661_v56, %s2124_s4 }
 0xf03   :  { %v859_v57 = vpop.permute.xlu0 %858 }
 0xf04   :  { %v861_v58 = vmul.f32 %v1927_v51, %v859_v57  ;;  %v884_v59 = vpop.permute.xlu1 %883 }
 0xf05   :  { %v886_v60 = vmul.f32 %v1929_v52, %v884_v59 }
 0xf06   :  { %863 = vrot.lane.b32.xlu0 %v861_v58, %s2125_s11  ;;  %v1127_v58 = vld [vmem:[#allocation2 + $0xe] sm:$0x3] }
 0xf07   :  { %888 = vrot.lane.b32.xlu1 %v886_v60, %s2125_s11 }
 0xf78   :  { %v864_v62 = vpop.permute.xlu0 %863 }
 0xf79   :  { %v2427_v0 = vadd.f32 %v864_v62, %v856_v61  ;;  %v889_v2 = vpop.permute.xlu1 %888 }
 0xf7a   :  { %v2429_v3 = vadd.f32 %v889_v2, %v881_v63 }
 0xf7b   :  { %1930 = vtanh.f32 %v2427_v0 }
 0xf7c   :  { %1932 = vtanh.f32 %v2429_v3 }
 0xf85   :  { %v1931_v4 = vpop.eup %1930 }
 0xf86   :  { %v1933_v17 = vpop.eup %1932  ;;  %869 = vrot.lane.b32.xlu0 %v1931_v4, %s2124_s4 }
 0xf87   :  { %894 = vrot.lane.b32.xlu1 %v1933_v17, %s2124_s4 }
 0xff8   :  { %v870_v7 = vpop.permute.xlu0 %869 }
 0xff9   :  { %v872_v8 = vmul.f32 %v1927_v51, %v870_v7  ;;  %v895_v9 = vpop.permute.xlu1 %894 }
 0xffa   :  { %v2435_v10 = vmul.f32 %v1929_v52, %v895_v9 }
 0xffb   :  { %905 = vrot.lane.b32.xlu0 %v872_v8, %s2125_s11 }
 0xffc   :  { %908 = vrot.lane.b32.xlu1 %v2435_v10, %s2124_s4 }
0x106d   :  { %v906_v11 = vpop.permute.xlu0 %905 }
0x106e   :  { %v909_v12 = vpop.permute.xlu1 %908 }
0x106f   :  { %v911_v13 = vsel %vm204_vm0, %v906_v11, %v909_v12 }
0x1070   :  { %1662 = vmatmul.mubr.msk.f32.vlgmr.msra.gmra.mrb[4].mxu1 %vm206_vm1, %v911_v13 }
0x1071   :  { %1825 = vmatpush1.bf16.msra.mxu1 %v2245_v21  ;;  %1261 = vmatprep.mubr.f32.mxu1 %v2126_v39 }
0x1072   :  { %1827 = vmatprep.subr.bf16.mxu1 %v2247_v22 }
0x1075   :  { %1829 = vmatpush1.bf16.msra.mxu1 %v2252_v27 }
0x1076   :  { %1831 = vmatprep.subr.bf16.mxu1 %v2256_v28 }
0x1079   :  { %1833 = vmatpush1.bf16.msra.mxu1 %v2260_v33 }
0x107a   :  { %1835 = vmatprep.subr.bf16.mxu1 %v2264_v34 }
0x107d   :  { %1837 = vmatpush1.bf16.msra.mxu1 %v2269_v38 }
0x1143   :  { %v981_v15 = vpop.f32.mrb[4].mxu1 }
0x1144   :  { %v987_v16 = vadd.f32 %v986_v14, %v981_v15  ;;  %v983_v19 = vpop.f32.mrb[5].mxu1 }
0x1145   :  { %v988_v21 = vadd.f32 %v2296_v47, %v983_v19 }
0x1146   :  { %v1663_v20 = vmul.f32 -1.442695, %v987_v16 }
0x1147   :  { %v1665_v23 = vmul.f32 -1.442695, %v988_v21 }
0x1148   :  { %1934 = vpow2.f32 %v1663_v20 }
0x1149   :  { %1936 = vpow2.f32 %v1665_v23 }
0x1152   :  { %v1935_v22 = vpop.eup %1934 }
0x1153   :  { %v1937_v27 = vpop.eup %1936  ;;  %v992_v24 = vadd.f32 1.0, %v1935_v22 }
0x1154   :  { %v1017_v28 = vadd.f32 1.0, %v1937_v27 }
0x1155   :  { %1938 = vrcp.f32 %v992_v24 }
0x1156   :  { %1940 = vrcp.f32 %v1017_v28 }
0x115f   :  { %v1939_v33 = vpop.eup %1938 }
0x1160   :  { %v1941_v34 = vpop.eup %1940  ;;  %v995_v25 = vmul.f32 2.0, %v1939_v33  ;;  %v997_v37 = vmul.f32 %v1939_v33, %v2427_v0 }
0x1161   :  { %v1020_v38 = vmul.f32 2.0, %v1941_v34  ;;  %v1022_v41 = vmul.f32 %v1941_v34, %v2429_v3 }
0x1162   :  { %v1664_v26 = vadd.f32 -1.0, %v995_v25 }
0x1163   :  { %v1666_v29 = vadd.f32 -1.0, %v1020_v38 }
0x1164   :  { %999 = vrot.lane.b32.xlu0 %v1664_v26, %s2124_s4 }
0x1165   :  { %1024 = vrot.lane.b32.xlu1 %v1666_v29, %s2124_s4 }
0x11d6   :  { %v1000_v31 = vpop.permute.xlu0 %999 }
0x11d7   :  { %v1002_v32 = vmul.f32 %v1939_v33, %v1000_v31  ;;  %v1025_v35 = vpop.permute.xlu1 %1024 }
0x11d8   :  { %v1027_v36 = vmul.f32 %v1941_v34, %v1025_v35 }
0x11d9   :  { %1004 = vrot.lane.b32.xlu0 %v1002_v32, %s2125_s11 }
0x11da   :  { %1029 = vrot.lane.b32.xlu1 %v1027_v36, %s2125_s11 }
0x124b   :  { %v1005_v40 = vpop.permute.xlu0 %1004 }
0x124c   :  { %v1007_v42 = vadd.f32 %v1005_v40, %v997_v37  ;;  %v1030_v43 = vpop.permute.xlu1 %1029 }
0x124d   :  { %v1032_v44 = vadd.f32 %v1030_v43, %v1022_v41 }
0x124e   :  { %1942 = vtanh.f32 %v1007_v42 }
0x124f   :  { %1944 = vtanh.f32 %v1032_v44 }
0x1258   :  { %v1943_v45 = vpop.eup %1942 }
0x1259   :  { %v1945_v46 = vpop.eup %1944  ;;  %1010 = vrot.lane.b32.xlu0 %v1943_v45, %s2124_s4 }
0x125a   :  { %1035 = vrot.lane.b32.xlu1 %v1945_v46, %s2124_s4 }
0x12cb   :  { %v1011_v51 = vpop.permute.xlu0 %1010 }
0x12cc   :  { %v1013_v52 = vmul.f32 %v1939_v33, %v1011_v51  ;;  %v1036_v53 = vpop.permute.xlu1 %1035 }
0x12cd   :  { %v2459_v54 = vmul.f32 %v1941_v34, %v1036_v53  ;;  %v2128_v53 = vmov 0.0|0.0  }
0x12ce   :  { %1046 = vrot.lane.b32.xlu0 %v1013_v52, %s2125_s11  ;;  %1838 = vmatprep.subr.bf16.mxu0 %v2128_v53 }
0x12cf   :  { %1049 = vrot.lane.b32.xlu1 %v2459_v54, %s2124_s4  ;;  %1844 = vmatprep.subr.bf16.mxu1 %v2128_v53 }
0x1340   :  { %v1047_v55 = vpop.permute.xlu0 %1046 }
0x1341   :  { %v1050_v56 = vpop.permute.xlu1 %1049 }
0x1342   :  { %v1052_v57 = vsel %vm204_vm0, %v1047_v55, %v1050_v56  ;;  %v1313_v55 = vld [vmem:[#allocation11] sm:$0xff]  ;;  %v1314_v56 = vld [vmem:[#allocation11 + $0x8] sm:$0xff] }
0x1343   :  { %1667 = vmatmul.mubr.msk.f32.vlgmr.msra.gmra.mrb[6].mxu0 %vm206_vm1, %v1052_v57  ;;  %v1839_v57 = vpack.c.bf16 %v1314_v56, %v1313_v55 }
0x1344   :  { %1696 = vmatprep.mubr.msk.f32.mxu0 %vm2129_vm3, %v2126_v39 }
0x1345   :  { %1840 = vmatpush3.bf16.msra.mxu0 %v1839_v57 }
0x1346   :  { %1841 = vmatprep.subr.bf16.mxu0 %v2128_v53 }
0x1416   :  { %v1122_v59 = vpop.f32.mrb[6].mxu0 }
0x1417   :  { %v1128_v60 = vadd.f32 %v1127_v58, %v1122_v59  ;;  %v1124_v61 = vpop.f32.mrb[7].mxu0  ;;  %v1315_v58 = vld [vmem:[#allocation11 + $0x10] sm:$0xff]  ;;  %v1316_v59 = vld [vmem:[#allocation11 + $0x18] sm:$0xff] }
0x1418   :  { %v1129_v62 = vadd.f32 %v2296_v47, %v1124_v61 }
0x1419   :  { %v1668_v63 = vmul.f32 -1.442695, %v1128_v60 }
0x141a   :  { %v1670_v0 = vmul.f32 -1.442695, %v1129_v62 }
0x141b   :  { %1946 = vpow2.f32 %v1668_v63 }
0x141c   :  { %1948 = vpow2.f32 %v1670_v0 }
0x1425   :  { %v1947_v2 = vpop.eup %1946 }
0x1426   :  { %v1949_v3 = vpop.eup %1948  ;;  %v1133_v4 = vadd.f32 1.0, %v1947_v2 }
0x1427   :  { %v1158_v17 = vadd.f32 1.0, %v1949_v3 }
0x1428   :  { %1950 = vrcp.f32 %v1133_v4 }
0x1429   :  { %1952 = vrcp.f32 %v1158_v17 }
0x1432   :  { %v1951_v5 = vpop.eup %1950 }
0x1433   :  { %v1953_v6 = vpop.eup %1952  ;;  %v1136_v7 = vmul.f32 2.0, %v1951_v5  ;;  %v1138_v16 = vmul.f32 %v1951_v5, %v1007_v42 }
0x1434   :  { %v1161_v8 = vmul.f32 2.0, %v1953_v6  ;;  %v1163_v21 = vmul.f32 %v1953_v6, %v1032_v44 }
0x1435   :  { %v1669_v9 = vadd.f32 -1.0, %v1136_v7 }
0x1436   :  { %v1671_v11 = vadd.f32 -1.0, %v1161_v8 }
0x1437   :  { %1140 = vrot.lane.b32.xlu0 %v1669_v9, %s2124_s4 }
0x1438   :  { %1165 = vrot.lane.b32.xlu1 %v1671_v11, %s2124_s4 }
0x14a9   :  { %v1141_v12 = vpop.permute.xlu0 %1140 }
0x14aa   :  { %v1143_v13 = vmul.f32 %v1951_v5, %v1141_v12  ;;  %v1166_v14 = vpop.permute.xlu1 %1165 }
0x14ab   :  { %v1168_v15 = vmul.f32 %v1953_v6, %v1166_v14 }
0x14ac   :  { %1145 = vrot.lane.b32.xlu0 %v1143_v13, %s2125_s11 }
0x14ad   :  { %1170 = vrot.lane.b32.xlu1 %v1168_v15, %s2125_s11 }
0x151e   :  { %v1146_v19 = vpop.permute.xlu0 %1145 }
0x151f   :  { %v1148_v20 = vadd.f32 %v1146_v19, %v1138_v16  ;;  %v1171_v23 = vpop.permute.xlu1 %1170 }
0x1520   :  { %v1173_v22 = vadd.f32 %v1171_v23, %v1163_v21 }
0x1521   :  { %1954 = vtanh.f32 %v1148_v20 }
0x1522   :  { %1956 = vtanh.f32 %v1173_v22 }
0x152b   :  { %v1955_v27 = vpop.eup %1954 }
0x152c   :  { %v1957_v24 = vpop.eup %1956  ;;  %1151 = vrot.lane.b32.xlu0 %v1955_v27, %s2124_s4 }
0x152d   :  { %1176 = vrot.lane.b32.xlu1 %v1957_v24, %s2124_s4 }
0x159e   :  { %v1152_v28 = vpop.permute.xlu0 %1151 }
0x159f   :  { %v1154_v33 = vmul.f32 %v1951_v5, %v1152_v28  ;;  %v1177_v34 = vpop.permute.xlu1 %1176 }
0x15a0   :  { %v1179_v25 = vmul.f32 %v1953_v6, %v1177_v34 }
0x15a1   :  { %1187 = vrot.lane.b32.xlu0 %v1154_v33, %s2125_s11 }
0x15a2   :  { %1190 = vrot.lane.b32.xlu1 %v1179_v25, %s2124_s4 }
0x1613   :  { %v1188_v38 = vpop.permute.xlu0 %1187 }
0x1614   :  { %1299 = vst.msk [vmem:[#allocation13] sm:$0x3] %vm338_vm2, %v1188_v38  ;;  %v1191_v26 = vpop.permute.xlu1 %1190 }
0x1615   :  { %v1193_v29 = vsel %vm204_vm0, %v1188_v38, %v1191_v26 }
0x1616   :  { %1672 = vmatmul.mubr.msk.f32.vlgmr.msra.gmra.mrb[6].mxu1 %vm206_vm1, %v1193_v29 }
0x1617   :  { %1846 = vmatpush3.bf16.msra.mxu1 %v1839_v57  ;;  %1707 = vmatprep.mubr.msk.f32.mxu1 %vm2129_vm3, %v2126_v39 }
0x1618   :  { %1847 = vmatprep.subr.bf16.mxu1 %v2128_v53 }
0x16e9   :  { %v1263_v31 = vpop.f32.mrb[6].mxu1 }
0x16ea   :  { %v1264_v32 = vpop.f32.mrb[7].mxu1 }
0x16eb   :  { %v1267_v35 = vadd.f32 %v2296_v47, %v1264_v32 }
0x16ed   :  { %v1673_v36 = vmul.f32 -1.442695, %v1267_v35 }
0x16ef   :  { %1958 = vpow2.f32 %v1673_v36 }
0x16f9   :  { %v1959_v37 = vpop.eup %1958 }
0x16fa   :  { %v1271_v40 = vadd.f32 1.0, %v1959_v37 }
0x16fc   :  { %1960 = vrcp.f32 %v1271_v40 }
0x1706   :  { %v1961_v41 = vpop.eup %1960 }
0x1707   :  { %v1274_v42 = vmul.f32 2.0, %v1961_v41  ;;  %v1276_v47 = vmul.f32 %v1961_v41, %v1173_v22 }
0x1709   :  { %v1674_v43 = vadd.f32 -1.0, %v1274_v42 }
0x170b   :  { %1278 = vrot.lane.b32.xlu0 %v1674_v43, %s2124_s4 }
0x177d   :  { %v1279_v44 = vpop.permute.xlu0 %1278 }
0x177e   :  { %v1281_v45 = vmul.f32 %v1961_v41, %v1279_v44 }
0x1780   :  { %1283 = vrot.lane.b32.xlu1 %v1281_v45, %s2125_s11 }
0x1784   :  { %476 = vrot.lane.b32.xlu1 %v2343_v1, %s2125_s11 }
0x1788   :  { %335 = vrot.lane.b32.xlu1 %v2312_v18, %s2125_s11 }
0x178c   :  { %899 = vrot.lane.b32.xlu1 %v2435_v10, %s2125_s11 }
0x1790   :  { %1181 = vrot.lane.b32.xlu1 %v1179_v25, %s2125_s11 }
0x1794   :  { %1303 = vrot.lane.b32.xlu1 %v1148_v20, %s2127_s19 }
0x17f2   :  { %v1284_v46 = vpop.permute.xlu1 %1283 }
0x17f3   :  { %v1286_v48 = vadd.f32 %v1284_v46, %v1276_v47 }
0x17f5   :  { %1962 = vtanh.f32 %v1286_v48 }
0x17f6   :  { %v477_v49 = vpop.permute.xlu1 %476 }
0x17f7   :  { %480 = vst.msk [vmem:[#allocation3 + $0x2] sm:$0x3] %vm338_vm2, %v477_v49 }
0x17fa   :  { %v336_v51 = vpop.permute.xlu1 %335 }
0x17fb   :  { %339 = vst.msk [vmem:[#allocation3] sm:$0x3] %vm338_vm2, %v336_v51 }
0x17fe   :  { %v900_v1 = vpop.permute.xlu1 %899  ;;  %v1319_v63 = vld [vmem:[#allocation3 + $0x2] sm:$0x1]  ;;  %v1443_v3 = vld [vmem:[#allocation3 + $0x3] sm:$0x1] }
0x17ff   :  { %v1963_v18 = vpop.eup %1962  ;;  %903 = vst.msk [vmem:[#allocation3 + $0x8] sm:$0x3] %vm338_vm2, %v900_v1  ;;  %v1327_v17 = vrot.slane %v1319_v63, 7  ;;  %v1451_v11 = vrot.slane %v1443_v3, 7 }
0x1800   :  { %1289 = vrot.lane.b32.xlu0 %v1963_v18, %s2124_s4  ;;  %s2130_s4 = smov [#allocation13]  }
0x1801   :  { %s1570_s20 = sshll.u32 %s2130_s4, 4  ;;  %s1571_s20 = int_to_ptr.vmem [resolvable:$true] %s1570_s20 }
0x1802   :  { %v1182_v10 = vpop.permute.xlu1 %1181  ;;  %v1318_v5 = vld [vmem:[#allocation3] sm:$0x1]  ;;  %v1442_v7 = vld [vmem:[#allocation3 + $0x1] sm:$0x1]  ;;  %s2040_s21 = scalar_lea.vmem %s1571_s20, 64  ;;  %p2045_p0 = scmp.lt.s32.totalorder %s1571_s20, %s1571_s20 }
0x1803   :  { %1185 = vst.msk [vmem:[#allocation3 + $0xc] sm:$0x3] %vm338_vm2, %v1182_v10  ;;  %v1348_v19 = vsel %vm1347_vm4, %v1318_v5, %v1327_v17  ;;  %v1471_v20 = vsel %vm1347_vm4, %v1442_v7, %v1451_v11  ;;  %p2041_p13 = scmp.ne.s32.totalorder %s1571_s20, %s2040_s21  ;;  %p2046_p1 = scmp.lt.s32.totalorder %s2040_s21, %s2040_s21 }
0x1804   :  { %617 = vrot.lane.b32.xlu0 %v2374_v50, %s2125_s11  ;;  %v1842_v50 = vpack.c.bf16 %v1316_v59, %v1315_v58 }
0x1805   :  { %p2047_p2 = por %p2046_p1, %p2045_p0 }
0x1806   :  { %v1304_v52 = vpop.permute.xlu1 %1303  ;;  %1843 = vmatpush3.bf16.msra.mxu0 %v1842_v50  ;;  %1849 = vmatpush3.bf16.msra.mxu1 %v1842_v50  ;;  %v1322_v16 = vld [vmem:[#allocation3 + $0x8] sm:$0x1]  ;;  %v1446_v21 = vld [vmem:[#allocation3 + $0x9] sm:$0x1] }
0x1807   :  { %1306 = vst.msk [vmem:[#allocation15] sm:$0x3] %vm338_vm2, %v1304_v52  ;;  %v1336_v38 = vrot.slane %v1322_v16, 4  ;;  %v1460_v26 = vrot.slane %v1446_v21, 4  ;;  %p2048_p3 = pnand %p2047_p2, %p2041_p13 }
0x1808   :  { %758 = vrot.lane.b32.xlu0 %v2405_v30, %s2125_s11 }
0x180a   :  { %v1324_v25 = vld [vmem:[#allocation3 + $0xc] sm:$0x1]  ;;  %v1448_v29 = vld [vmem:[#allocation3 + $0xd] sm:$0x1] }
0x180b   :  { %v1342_v35 = vrot.slane %v1324_v25, 2  ;;  %v1466_v42 = vrot.slane %v1448_v29, 2 }
0x180c   :  { %1040 = vrot.lane.b32.xlu0 %v2459_v54, %s2125_s11 }
0x1872   :  { %v1290_v30 = vpop.permute.xlu0 %1289 }
0x1873   :  { %v1292_v54 = vmul.f32 %v1961_v41, %v1290_v30 }
0x1875   :  { %1294 = vrot.lane.b32.xlu0 %v1292_v54, %s2125_s11 }
0x1876   :  { %v618_v60 = vpop.permute.xlu0 %617 }
0x1877   :  { %621 = vst.msk [vmem:[#allocation3 + $0x4] sm:$0x3] %vm338_vm2, %v618_v60 }
0x1879   :  { %1308 = vrot.lane.b32.xlu0 %v1286_v48, %s2127_s19 }
0x187a   :  { %v759_v61 = vpop.permute.xlu0 %758 }
0x187b   :  { %762 = vst.msk [vmem:[#allocation3 + $0x6] sm:$0x3] %vm338_vm2, %v759_v61 }
0x187e   :  { %v1041_v62 = vpop.permute.xlu0 %1040  ;;  %v1320_v0 = vld [vmem:[#allocation3 + $0x4] sm:$0x1]  ;;  %v1444_v39 = vld [vmem:[#allocation3 + $0x5] sm:$0x1] }
0x187f   :  { %1044 = vst.msk [vmem:[#allocation3 + $0xa] sm:$0x3] %vm338_vm2, %v1041_v62  ;;  %v1330_v6 = vrot.slane %v1320_v0, 6  ;;  %v1454_v8 = vrot.slane %v1444_v39, 6 }
0x1881   :  { %v1350_v23 = vsel %vm1349_vm5, %v1348_v19, %v1330_v6  ;;  %v1472_v22 = vsel %vm1349_vm5, %v1471_v20, %v1454_v8 }
0x1882   :  { %v1321_v2 = vld [vmem:[#allocation3 + $0x6] sm:$0x1]  ;;  %v1445_v4 = vld [vmem:[#allocation3 + $0x7] sm:$0x1] }
0x1883   :  { %v1333_v9 = vrot.slane %v1321_v2, 5  ;;  %v1457_v12 = vrot.slane %v1445_v4, 5 }
0x1885   :  { %v1352_v24 = vsel %vm1351_vm6, %v1350_v23, %v1333_v9  ;;  %v1473_v33 = vsel %vm1351_vm6, %v1472_v22, %v1457_v12 }
0x1886   :  { %v1323_v14 = vld [vmem:[#allocation3 + $0xa] sm:$0x1]  ;;  %v1447_v15 = vld [vmem:[#allocation3 + $0xb] sm:$0x1]  ;;  %v1354_v31 = vsel %vm1353_vm7, %v1352_v24, %v1336_v38  ;;  %v1474_v32 = vsel %vm1353_vm7, %v1473_v33, %v1460_v26 }
0x1887   :  { %v1339_v27 = vrot.slane %v1323_v14, 3  ;;  %v1463_v28 = vrot.slane %v1447_v15, 3 }
0x1889   :  { %v1356_v36 = vsel %vm1355_vm8, %v1354_v31, %v1339_v27  ;;  %v1475_v37 = vsel %vm1355_vm8, %v1474_v32, %v1463_v28 }
0x188a   :  { %v1358_v45 = vsel %vm1357_vm9, %v1356_v36, %v1342_v35  ;;  %v1476_v47 = vsel %vm1357_vm9, %v1475_v37, %v1466_v42 }
0x18e7   :  { %v1295_v13 = vpop.permute.xlu0 %1294 }
0x18e8   :  { %1298 = vst.msk [vmem:[#allocation3 + $0xe] sm:$0x3] %vm338_vm2, %v1295_v13  ;;  %1301 = vst.msk [vmem:[#allocation13 + $0x2] sm:$0x3] %vm338_vm2, %v1295_v13 }
0x18eb   :  { %v1309_v34 = vpop.permute.xlu0 %1308 }
0x18ec   :  { %1312 = vst.msk [vmem:[#allocation15 + $0x2] sm:$0x3] %vm338_vm2, %v1309_v34 }
0x18ef   :  { %v1325_v40 = vld [vmem:[#allocation3 + $0xe] sm:$0x1]  ;;  %v1449_v41 = vld [vmem:[#allocation3 + $0xf] sm:$0x1] }
0x18f0   :  { %v1345_v43 = vrot.slane %v1325_v40, 1  ;;  %v1469_v44 = vrot.slane %v1449_v41, 1 }
0x18f2   :  { %v1360_v46 = vsel %vm1359_vm10, %v1358_v45, %v1345_v43  ;;  %v1477_v48 = vsel %vm1359_vm10, %v1476_v47, %v1469_v44 }
0x18f3   :  { %1697 = vmatmul.mubr.msk.f32.vlgmr.msra.gmra.mrb[8].mxu0 %vm204_vm0, %v1360_v46  ;;  %1708 = vmatmul.mubr.msk.f32.vlgmr.msra.gmra.mrb[8].mxu1 %vm204_vm0, %v1477_v48 }
0x18f4   :  { %2051 = shalt.err (!%p2048_p3)
}
0x18f5   :  { %s2052_s24 = scalar_lea.hbm %s2568_s7, 64 }
0x18f6   :  { %p2053_p4 = scmp.ne.s32.totalorder %s2568_s7, %s2052_s24  ;;  %p2056_p5 = scmp.lt.u32.totalorder %s2052_s24, %s2568_s7 }
0x18f8   :  { %p2058_p6 = pnand %p2056_p5, %p2053_p4 }
0x18fa   :  { %2061 = shalt.err (!%p2058_p6)
}
0x18fb   :  { %s2131_s1 = smov 2   ;;  %s2132_s30 = smov [#allocation15]  }
0x18fc   :  { %1576 = dma.vmem_to_hbm [thread:$0]  %s1571_s20, 64, %s2568_s7, [#allocation14], %s2125_s11, %s2125_s11, %s2131_s1  }
0x18fd   :  { %s1582_s9 = sshll.u32 %s2132_s30, 4  ;;  %s1583_s9 = int_to_ptr.vmem [resolvable:$true] %s1582_s9 }
0x18fe   :  { %s2062_s10 = scalar_lea.vmem %s1583_s9, 64  ;;  %p2067_p8 = scmp.lt.s32.totalorder %s1583_s9, %s1583_s9 }
0x18ff   :  { %p2063_p7 = scmp.ne.s32.totalorder %s1583_s9, %s2062_s10  ;;  %p2068_p9 = scmp.lt.s32.totalorder %s2062_s10, %s2062_s10 }
0x1901   :  { %p2069_p10 = por %p2068_p9, %p2067_p8 }
0x1903   :  { %p2070_p11 = pnand %p2069_p10, %p2063_p7 }
0x1905   :  { %2073 = shalt.err (!%p2070_p11)
}
0x1906   :  { %s2074_s14 = scalar_lea.hbm %s2569_s8, 64 }
0x1907   :  { %p2075_p12 = scmp.ne.s32.totalorder %s2569_s8, %s2074_s14  ;;  %p2078_p13 = scmp.lt.u32.totalorder %s2074_s14, %s2569_s8 }
0x1909   :  { %p2080_p0 = pnand %p2078_p13, %p2075_p12 }
0x190b   :  { %2083 = shalt.err (!%p2080_p0)
}
0x190c   :  { %1588 = dma.vmem_to_hbm [thread:$0]  %s1583_s9, 64, %s2569_s8, [#allocation14], %s2125_s11, %s2125_s11, %s2131_s1   ;;  %vm1440_vm11 = vcmask 228352  }
0x190d   :  { %v1675_v49 = vld [vmem:[%s2566_s5] ss:$0 sm:$0xff]  ;;  %s2133_s21 = smov [#allocation12]  }
0x190e   :  { %s1558_s22 = sshll.u32 %s2133_s21, 4  ;;  %s1559_s22 = int_to_ptr.vmem [resolvable:$true] %s1558_s22 }
0x190f   :  { %s2084_s23 = scalar_lea.vmem %s1559_s22, 256  ;;  %p2089_p2 = scmp.lt.s32.totalorder %s1559_s22, %s1559_s22 }
0x1910   :  { %p2085_p1 = scmp.ne.s32.totalorder %s1559_s22, %s2084_s23  ;;  %p2090_p3 = scmp.lt.s32.totalorder %s2084_s23, %s2084_s23 }
0x1912   :  { %p2091_p4 = por %p2090_p3, %p2089_p2 }
0x1914   :  { %p2092_p5 = pnand %p2091_p4, %p2085_p1 }
0x19c6   :  { %v1436_v51 = vpop.f32.mrb[8].mxu0  ;;  %v1547_v1 = vpop.f32.mrb[8].mxu1 }
0x19c7   :  { %v1437_v18 = vadd.f32 %v1675_v49, %v1436_v51  ;;  %v1548_v10 = vadd.f32 %v1675_v49, %v1547_v1  ;;  %v1698_v52 = vpop.f32.mrb[9].mxu0  ;;  %v1709_v53 = vpop.f32.mrb[9].mxu1 }
0x19c9   :  { %1441 = vst.msk [vmem:[#allocation12] sm:$0xff] %vm1440_vm11, %v1437_v18  ;;  %1552 = vst.msk [vmem:[#allocation12 + $0x8] sm:$0xff] %vm1440_vm11, %v1548_v10 }
0x19ca   :  { %2095 = shalt.err (!%p2092_p5)
}
0x19cb   :  { %s2096_s11 = scalar_lea.hbm %s2567_s6, 256 }
0x19cc   :  { %p2097_p6 = scmp.ne.s32.totalorder %s2567_s6, %s2096_s11  ;;  %p2100_p7 = scmp.lt.u32.totalorder %s2096_s11, %s2567_s6 }
0x19ce   :  { %p2102_p8 = pnand %p2100_p7, %p2097_p6 }
0x19d0   :  { %2105 = shalt.err (!%p2102_p8)
}
0x19d1   :  { %1564 = dma.vmem_to_hbm [thread:$0]  %s1559_s22, 256, %s2567_s6, [#allocation6], %s2121_s0, %s2121_s0, %s2122_s16  }
0x19d2   :  { %2112 = dma.done.wait [#allocation6], 256  }
0x19d3   :  { %2113 = vsyncadd [#allocation6], 4294967040 }
0x19d4   :  { %2114 = dma.done.wait [#allocation14], 128  }
0x19d5   :  { %2115 = vsyncadd [#allocation14], 4294967168 }
0x19d6   :  { %1598 = vsyncpa [#allocation5], 1 }
0x19d7   :  { %1599 = vsyncpa [#allocation10], 1 }
0x19d8   :  { %1600 = vsyncpa [#allocation6], 1 }
0x19d9   :  { %1601 = vsyncpa [#allocation14], 1 }
0x19da   :  { %1602 = vsyncpa [#allocation7], 1 }

</bundles_post_ra>
